<compile_context>
chip_gen: v6e
topology: v6e:2x2x1
jax: 0.10.0
libtpu: 0.0.40
codegen_flags: <defaults>
</compile_context>

<pallas_src>
import functools

import jax
import jax.numpy as jnp
from jax.experimental import pallas as pl
from jax.experimental.pallas import tpu as pltpu


def _gnn_fused_kernel(
    a_in_ref,      # (1, M, M)  block-diagonal in-adjacency for this batch block
    a_out_ref,     # (1, M, M)  block-diagonal out-adjacency
    h_ref,         # (TB, N, Hp) zero-padded hidden (f32)
    w_edge_ref,    # (Hp, 2*Hp)  [W_in^T | W_out^T], halves at lanes 0 and Hp
    b_edge_ref,    # (1, 2*Hp)
    w_ih_ref,      # (2*Hp, 3*Hp) rows [0:H]=input_in half, [Hp:Hp+H]=input_out half
    b_ih_ref,      # (1, 3*Hp)
    w_hh_ref,      # (Hp, 3*Hp)
    b_hh_ref,      # (1, 3*Hp)
    b_iah_ref,     # (1, Hp)
    b_oah_ref,     # (1, Hp)
    o_ref,         # (TB, N, Hp)
    *,
    step,
    merge_gi,
    compute_dtype,
):
    tb, n, hp = h_ref.shape
    m = tb * n
    cd = compute_dtype
    f32 = jnp.float32

    a_in = a_in_ref[0]        # (M, M)
    a_out = a_out_ref[0]
    w_edge = w_edge_ref[...]
    w_ih = w_ih_ref[...]
    w_hh = w_hh_ref[...]

    # Hoist bias sublane-broadcasts out of the (unrolled) step loop — JAX does
    # not CSE broadcast_in_dim, so doing it here issues each broadcast once.
    b_edge = jnp.broadcast_to(b_edge_ref[...], (m, 2 * hp))
    b_ih = jnp.broadcast_to(b_ih_ref[...], (m, 3 * hp))
    b_hh = jnp.broadcast_to(b_hh_ref[...], (m, 3 * hp))
    b_iah = jnp.broadcast_to(b_iah_ref[...], (m, hp))
    b_oah = jnp.broadcast_to(b_oah_ref[...], (m, hp))

    # Fold batch into the matmul M dimension; GRU state stays f32 and VMEM/vreg
    # resident across all steps (single fused pallas_call).
    h2 = h_ref[...].reshape(m, hp)

    for _ in range(step):  # step is a small static int — unrolled at trace time
        # Merged linear_edge_in / linear_edge_out: one MXU call -> [h_in | h_out].
        hio = jnp.dot(h2.astype(cd), w_edge, preferred_element_type=f32) + b_edge
        h_in = hio[:, :hp].astype(cd)        # lane-aligned slices at Hp
        h_out = hio[:, hp:].astype(cd)

        # Graph propagation as full-shape block-diagonal matmuls (one MXU call
        # per direction instead of TB tiny per-session matmuls).
        inp_in = jnp.dot(a_in, h_in, preferred_element_type=f32) + b_iah
        inp_out = jnp.dot(a_out, h_out, preferred_element_type=f32) + b_oah

        if merge_gi:
            # Lane-concat at the aligned Hp boundary (contiguous, no relayout),
            # then a single K=2*Hp matmul — fills the 256-deep v6e/v7x MXU.
            inputs = jnp.concatenate([inp_in, inp_out], axis=1).astype(cd)
            gi = jnp.dot(inputs, w_ih, preferred_element_type=f32) + b_ih
        else:
            # v5e-friendly form: two K=Hp matmuls accumulated (128-deep MXU).
            gi = (jnp.dot(inp_in.astype(cd), w_ih[:hp], preferred_element_type=f32)
                  + jnp.dot(inp_out.astype(cd), w_ih[hp:], preferred_element_type=f32)
                  + b_ih)
        gh = jnp.dot(h2.astype(cd), w_hh, preferred_element_type=f32) + b_hh

        i_r, i_i, i_n = gi[:, :hp], gi[:, hp:2 * hp], gi[:, 2 * hp:]
        h_r, h_i, h_n = gh[:, :hp], gh[:, hp:2 * hp], gh[:, 2 * hp:]

        resetgate = jax.nn.sigmoid(i_r + h_r)
        inputgate = jax.nn.sigmoid(i_i + h_i)
        newgate = jnp.tanh(i_n + resetgate * h_n)
        h2 = newgate + inputgate * (h2 - newgate)   # padded lanes stay exactly 0

    o_ref[...] = h2.reshape(tb, n, hp).astype(o_ref.dtype)


def _pack_params(params, H, Hp, compute_dtype=jnp.float32):
    """Re-lay parameters: merge edge weights, gate-block lane alignment at g*Hp,
    input_in/input_out row halves of w_ih at rows 0 and Hp. All pad lanes/rows
    are explicit zeros (required for the pad-invariance of the GRU update)."""
    G = 3
    f32 = jnp.float32

    def gate_cols(w):  # (rows, 3H) -> (rows, 3*Hp), gate block g at lanes g*Hp
        out = jnp.zeros((w.shape[0], G * Hp), f32)
        for g in range(G):
            out = out.at[:, g * Hp:g * Hp + H].set(w[:, g * H:(g + 1) * H])
        return out

    def pad_vec(v):  # (1, H) -> (1, Hp)
        return jnp.zeros((1, Hp), f32).at[:, :H].set(v)

    # Combined edge weight: h @ w_edge = [h_in | h_out] (halves at lanes 0, Hp).
    w_edge = jnp.zeros((Hp, 2 * Hp), f32)
    w_edge = w_edge.at[:H, :H].set(params["w_in_t"])
    w_edge = w_edge.at[:H, Hp:Hp + H].set(params["w_out_t"])
    b_edge = jnp.zeros((1, 2 * Hp), f32)
    b_edge = b_edge.at[:, :H].set(params["b_in"])
    b_edge = b_edge.at[:, Hp:Hp + H].set(params["b_out"])

    w_ih_t = params["w_ih_t"]  # (2H, 3H): rows [:H] -> input_in, [H:] -> input_out
    w_ih = jnp.zeros((2 * Hp, 3 * Hp), f32)
    w_ih = w_ih.at[:H].set(gate_cols(w_ih_t[:H]))
    w_ih = w_ih.at[Hp:Hp + H].set(gate_cols(w_ih_t[H:]))

    w_hh = jnp.zeros((Hp, 3 * Hp), f32)
    w_hh = w_hh.at[:H].set(gate_cols(params["w_hh_t"]))

    cd = compute_dtype
    return {
        "w_edge": w_edge.astype(cd),
        "b_edge": b_edge,
        "w_ih": w_ih.astype(cd),
        "b_ih": gate_cols(params["b_ih"]),
        "w_hh": w_hh.astype(cd),
        "b_hh": gate_cols(params["b_hh"]),
        "b_iah": pad_vec(params["b_iah"]),
        "b_oah": pad_vec(params["b_oah"]),
    }


def _default_batch_block(B, N, target_rows=512):
    """Largest divisor TB of B with TB*N <= target_rows and grid = B//TB >= 2."""
    if B <= 1:
        return max(B, 1)
    best = 1
    for tb in range(1, B // 2 + 1):
        if B % tb == 0 and tb * N <= target_rows:
            best = tb
    return best


def gnn_forward(A, hidden, params, step=1, batch_block=None,
                compute_dtype=jnp.float32, merge_gi=True):
    """Fused multi-step GNN forward. A: [B, N, 2N], hidden: [B, N, H].

    batch_block (TB) sessions form one grid block (m = TB*N matmul rows).
    compute_dtype=jnp.bfloat16 enables bf16 MXU feeds (v6e/v7x; ~1e-3 rel
    error expected — keep f32 when 1e-5 accuracy is required, e.g. v5e).
    merge_gi=True uses a single K=2*Hp gi matmul (v6e/v7x); False keeps two
    K=Hp matmuls (optimal on v5e's 128-deep MXU).
    """
    B, N, H = hidden.shape
    assert A.shape == (B, N, 2 * N)
    Hp = ((H + 127) // 128) * 128                 # lane-pad the feature axis
    TB = _default_batch_block(B, N) if batch_block is None else batch_block
    assert B % TB == 0, "batch_block must divide the batch"
    G = B // TB
    M = TB * N

    f32 = jnp.float32
    cd = compute_dtype

    # Wrapper-side layout plumbing: split A and build per-grid-block
    # block-diagonal adjacencies (so propagation is one full-shape matmul).
    A_in = A[:, :, :N].astype(f32).reshape(G, TB, N, N)
    A_out = A[:, :, N:2 * N].astype(f32).reshape(G, TB, N, N)
    eye = jnp.eye(TB, dtype=f32)

    def block_diag(a):  # (G, TB, N, N) -> (G, TB*N, TB*N)
        return (a[:, :, :, None, :] * eye[None, :, None, :, None]).reshape(G, M, M)

    A_in_blk = block_diag(A_in).astype(cd)
    A_out_blk = block_diag(A_out).astype(cd)

    h_p = jnp.pad(hidden.astype(f32), ((0, 0), (0, 0), (0, Hp - H)))
    p = _pack_params(params, H, Hp, cd)

    operands = (A_in_blk, A_out_blk, h_p,
                p["w_edge"], p["b_edge"], p["w_ih"], p["b_ih"],
                p["w_hh"], p["b_hh"], p["b_iah"], p["b_oah"])

    # Scoped-VMEM budget: double-buffered block I/O + gate temporaries + weights,
    # with 2x headroom, clamped to be safe on v7x's 64 MiB physical VMEM.
    est = 4 * (4 * M * M + 4 * M * Hp + 16 * M * Hp)
    est += 2 * 4 * (Hp * 2 * Hp + 2 * Hp * 3 * Hp + Hp * 3 * Hp + 10 * Hp)
    vmem_limit = int(min(max(2 * est, 32 * 2 ** 20), 56 * 2 ** 20))

    bmap3 = lambda b: (b, 0, 0)

    def build(weight_mode):
        def const_spec(shape):
            idx = lambda b: (0,) * len(shape)
            if weight_mode is None:
                return pl.BlockSpec(shape, idx)
            return pl.BlockSpec(shape, idx, pipeline_mode=weight_mode)

        return pl.pallas_call(
            functools.partial(_gnn_fused_kernel, step=step, merge_gi=merge_gi,
                              compute_dtype=cd),
            out_shape=jax.ShapeDtypeStruct((B, N, Hp), f32),
            grid=(G,),
            in_specs=[
                pl.BlockSpec((1, M, M), bmap3),     # A_in  (block-diagonal)
                pl.BlockSpec((1, M, M), bmap3),     # A_out (block-diagonal)
                pl.BlockSpec((TB, N, Hp), bmap3),   # hidden (padded)
                const_spec((Hp, 2 * Hp)),           # w_edge
                const_spec((1, 2 * Hp)),            # b_edge
                const_spec((2 * Hp, 3 * Hp)),       # w_ih
                const_spec((1, 3 * Hp)),            # b_ih
                const_spec((Hp, 3 * Hp)),           # w_hh
                const_spec((1, 3 * Hp)),            # b_hh
                const_spec((1, Hp)),                # b_iah
                const_spec((1, Hp)),                # b_oah
            ],
            out_specs=pl.BlockSpec((TB, N, Hp), bmap3),
            input_output_aliases={2: 0},            # reuse padded-hidden buffer
            compiler_params=pltpu.CompilerParams(
                dimension_semantics=("parallel",),
                vmem_limit_bytes=vmem_limit),
        )

    try:
        # Single-buffer the grid-invariant weights (returns their 2nd VMEM copy).
        out = build(pl.Buffered(1))(*operands)
    except Exception:
        # Fallback for JAX builds that reject single-buffered pipeline_mode.
        out = build(None)(*operands)

    return out[..., :H].astype(hidden.dtype)


def session_graph_forward(item_ids, A, embedding, params, step=1,
                          batch_block=None, compute_dtype=jnp.float32,
                          merge_gi=True):
    """SessionGraph.forward: hidden = embedding(inputs); hidden = GNN(A, hidden)."""
    # Embedding gather stays in plain JAX (tiny, irregular; no Pallas win here).
    hidden = jnp.take(embedding, item_ids, axis=0)
    return gnn_forward(A, hidden, params, step=step, batch_block=batch_block,
                       compute_dtype=compute_dtype, merge_gi=merge_gi)


def _reference_cell(A, hidden, params):
    """Plain-JAX reference mirroring the PyTorch GNNCell semantics."""
    N = A.shape[1]
    h_in = hidden @ params["w_in_t"] + params["b_in"]
    h_out = hidden @ params["w_out_t"] + params["b_out"]
    input_in = jnp.matmul(A[:, :, :N], h_in) + params["b_iah"]
    input_out = jnp.matmul(A[:, :, N:2 * N], h_out) + params["b_oah"]
    inputs = jnp.concatenate([input_in, input_out], axis=2)
    gi = inputs @ params["w_ih_t"] + params["b_ih"]
    gh = hidden @ params["w_hh_t"] + params["b_hh"]
    H = hidden.shape[2]
    i_r, i_i, i_n = gi[..., :H], gi[..., H:2 * H], gi[..., 2 * H:]
    h_r, h_i, h_n = gh[..., :H], gh[..., H:2 * H], gh[..., 2 * H:]
    resetgate = jax.nn.sigmoid(i_r + h_r)
    inputgate = jax.nn.sigmoid(i_i + h_i)
    newgate = jnp.tanh(i_n + resetgate * h_n)
    return newgate + inputgate * (hidden - newgate)


def init_params(key, hidden_size):
    """Deterministic synthetic parameters (module __init__ shapes)."""
    H = hidden_size
    ks = jax.random.split(key, 10)
    scale = 1.0 / jnp.sqrt(H)
    u = lambda k, shape: jax.random.uniform(k, shape, jnp.float32, -scale, scale)
    # Stored pre-transposed so the kernel does x @ W^T directly.
    return {
        "w_ih_t": u(ks[0], (3 * H, 2 * H)).T,     # (2H, 3H)
        "w_hh_t": u(ks[1], (3 * H, H)).T,         # (H, 3H)
        "b_ih":   u(ks[2], (1, 3 * H)),
        "b_hh":   u(ks[3], (1, 3 * H)),
        "b_iah":  u(ks[4], (1, H)),
        "b_oah":  u(ks[5], (1, H)),
        "w_in_t": u(ks[6], (H, H)).T,             # linear_edge_in.weight^T
        "b_in":   u(ks[7], (1, H)),
        "w_out_t": u(ks[8], (H, H)).T,            # linear_edge_out.weight^T
        "b_out":  u(ks[9], (1, H)),
        # TODO(synk): linear_edge_f is defined in __init__ but unused in forward.
    }


if __name__ == "__main__":
    def run_case(B, N, H, n_node, step, **kw):
        key = jax.random.PRNGKey(0)
        k_a, k_i, k_e, k_p = jax.random.split(key, 4)
        # Row-normalized non-negative adjacency blocks, like SR-GNN session graphs.
        A_raw = jax.random.uniform(k_a, (B, N, 2 * N), jnp.float32)
        A = A_raw / jnp.sum(A_raw, axis=1, keepdims=True)
        item_ids = jax.random.randint(k_i, (B, N), 0, n_node)
        stdv = 1.0 / jnp.sqrt(H)
        embedding = jax.random.uniform(k_e, (n_node, H), jnp.float32, -stdv, stdv)
        params = init_params(k_p, H)

        out = session_graph_forward(item_ids, A, embedding, params, step=step, **kw)
        out = jax.block_until_ready(out)

        ref = embedding[item_ids]
        for _ in range(step):
            ref = _reference_cell(A, ref, params)

        assert out.shape == (B, N, H)
        assert jnp.allclose(out, ref, atol=1e-5, rtol=1e-5), \
            f"mismatch vs reference (B={B}, N={N}, step={step})"

    # grid=2 (TB=1), merged K=2*Hp gi matmul path.
    run_case(2, 8, 32, 64, 1)
    # TB=4 block-diagonal propagation, 2 GNN steps, split-K gi path (v5e form).
    run_case(8, 8, 32, 64, 2, merge_gi=False)
    print("KERNEL_OK")
</pallas_src>

<mosaic_0001>
module attributes {stable_mosaic.version = 11 : i64} {
  func.func @_gnn_fused_kernel(%arg0: i32, %arg1: memref<1x8x8xf32, #tpu.memory_space<vmem>>, %arg2: memref<1x8x8xf32, #tpu.memory_space<vmem>>, %arg3: memref<1x8x128xf32, #tpu.memory_space<vmem>>, %arg4: memref<128x256xf32, #tpu.memory_space<vmem>>, %arg5: memref<1x256xf32, #tpu.memory_space<vmem>>, %arg6: memref<256x384xf32, #tpu.memory_space<vmem>>, %arg7: memref<1x384xf32, #tpu.memory_space<vmem>>, %arg8: memref<128x384xf32, #tpu.memory_space<vmem>>, %arg9: memref<1x384xf32, #tpu.memory_space<vmem>>, %arg10: memref<1x128xf32, #tpu.memory_space<vmem>>, %arg11: memref<1x128xf32, #tpu.memory_space<vmem>>, %arg12: memref<1x8x128xf32, #tpu.memory_space<vmem>>) attributes {dimension_semantics = [#tpu.dimension_semantics<parallel>], iteration_bounds = array<i64: 2>, scalar_prefetch = 0 : i64, scratch_operands = 0 : i64, tpu.core_type = #tpu.core_type<tc>, window_params = [{transform_indices = @transform_0, window_bounds = array<i64: 1, 8, 8>}, {transform_indices = @transform_1, window_bounds = array<i64: 1, 8, 8>}, {transform_indices = @transform_2, window_bounds = array<i64: 1, 8, 128>}, {pipeline_mode = #tpu.pipeline_mode<synchronous>, transform_indices = @transform_3, window_bounds = array<i64: 128, 256>}, {pipeline_mode = #tpu.pipeline_mode<synchronous>, transform_indices = @transform_4, window_bounds = array<i64: 1, 256>}, {pipeline_mode = #tpu.pipeline_mode<synchronous>, transform_indices = @transform_5, window_bounds = array<i64: 256, 384>}, {pipeline_mode = #tpu.pipeline_mode<synchronous>, transform_indices = @transform_6, window_bounds = array<i64: 1, 384>}, {pipeline_mode = #tpu.pipeline_mode<synchronous>, transform_indices = @transform_7, window_bounds = array<i64: 128, 384>}, {pipeline_mode = #tpu.pipeline_mode<synchronous>, transform_indices = @transform_8, window_bounds = array<i64: 1, 384>}, {pipeline_mode = #tpu.pipeline_mode<synchronous>, transform_indices = @transform_9, window_bounds = array<i64: 1, 128>}, {pipeline_mode = #tpu.pipeline_mode<synchronous>, transform_indices = @transform_10, window_bounds = array<i64: 1, 128>}, {transform_indices = @transform_11, window_bounds = array<i64: 1, 8, 128>}]} {
    %c0 = arith.constant 0 : index
    %c0_0 = arith.constant 0 : index
    %c0_1 = arith.constant 0 : index
    %0 = vector.load %arg1[%c0, %c0_0, %c0_1] : memref<1x8x8xf32, #tpu.memory_space<vmem>>, vector<1x8x8xf32>
    %1 = vector.shape_cast %0 : vector<1x8x8xf32> to vector<8x8xf32>
    %c0_2 = arith.constant 0 : index
    %c0_3 = arith.constant 0 : index
    %c0_4 = arith.constant 0 : index
    %2 = vector.load %arg2[%c0_2, %c0_3, %c0_4] : memref<1x8x8xf32, #tpu.memory_space<vmem>>, vector<1x8x8xf32>
    %3 = vector.shape_cast %2 : vector<1x8x8xf32> to vector<8x8xf32>
    %c0_5 = arith.constant 0 : index
    %c0_6 = arith.constant 0 : index
    %4 = vector.load %arg4[%c0_5, %c0_6] : memref<128x256xf32, #tpu.memory_space<vmem>>, vector<128x256xf32>
    %c0_7 = arith.constant 0 : index
    %c0_8 = arith.constant 0 : index
    %5 = vector.load %arg6[%c0_7, %c0_8] : memref<256x384xf32, #tpu.memory_space<vmem>>, vector<256x384xf32>
    %c0_9 = arith.constant 0 : index
    %c0_10 = arith.constant 0 : index
    %6 = vector.load %arg8[%c0_9, %c0_10] : memref<128x384xf32, #tpu.memory_space<vmem>>, vector<128x384xf32>
    %c0_11 = arith.constant 0 : index
    %c0_12 = arith.constant 0 : index
    %7 = vector.load %arg5[%c0_11, %c0_12] : memref<1x256xf32, #tpu.memory_space<vmem>>, vector<1x256xf32>
    %8 = vector.shape_cast %7 : vector<1x256xf32> to vector<1x256xf32>
    %9 = vector.broadcast %8 : vector<1x256xf32> to vector<8x256xf32>
    %c0_13 = arith.constant 0 : index
    %c0_14 = arith.constant 0 : index
    %10 = vector.load %arg7[%c0_13, %c0_14] : memref<1x384xf32, #tpu.memory_space<vmem>>, vector<1x384xf32>
    %11 = vector.shape_cast %10 : vector<1x384xf32> to vector<1x384xf32>
    %12 = vector.broadcast %11 : vector<1x384xf32> to vector<8x384xf32>
    %c0_15 = arith.constant 0 : index
    %c0_16 = arith.constant 0 : index
    %13 = vector.load %arg9[%c0_15, %c0_16] : memref<1x384xf32, #tpu.memory_space<vmem>>, vector<1x384xf32>
    %14 = vector.shape_cast %13 : vector<1x384xf32> to vector<1x384xf32>
    %15 = vector.broadcast %14 : vector<1x384xf32> to vector<8x384xf32>
    %c0_17 = arith.constant 0 : index
    %c0_18 = arith.constant 0 : index
    %16 = vector.load %arg10[%c0_17, %c0_18] : memref<1x128xf32, #tpu.memory_space<vmem>>, vector<1x128xf32>
    %17 = vector.shape_cast %16 : vector<1x128xf32> to vector<1x128xf32>
    %18 = vector.broadcast %17 : vector<1x128xf32> to vector<8x128xf32>
    %c0_19 = arith.constant 0 : index
    %c0_20 = arith.constant 0 : index
    %19 = vector.load %arg11[%c0_19, %c0_20] : memref<1x128xf32, #tpu.memory_space<vmem>>, vector<1x128xf32>
    %20 = vector.shape_cast %19 : vector<1x128xf32> to vector<1x128xf32>
    %21 = vector.broadcast %20 : vector<1x128xf32> to vector<8x128xf32>
    %c0_21 = arith.constant 0 : index
    %c0_22 = arith.constant 0 : index
    %c0_23 = arith.constant 0 : index
    %22 = vector.load %arg3[%c0_21, %c0_22, %c0_23] : memref<1x8x128xf32, #tpu.memory_space<vmem>>, vector<1x8x128xf32>
    %23 = vector.shape_cast %22 : vector<1x8x128xf32> to vector<8x128xf32>
    %cst = arith.constant dense<0.000000e+00> : vector<8x256xf32>
    %24 = tpu.matmul %23, %4, %cst {dimension_numbers = #tpu.dot_dimension_numbers<[1], [0], [0], [1], [0, 0, 1, 1], [], []>} : vector<8x128xf32>, vector<128x256xf32>, vector<8x256xf32> -> vector<8x256xf32>
    %25 = arith.addf %24, %9 : vector<8x256xf32>
    %26 = vector.extract_strided_slice %25 {offsets = [0, 0], sizes = [8, 128], strides = [1, 1]} : vector<8x256xf32> to vector<8x128xf32>
    %27 = vector.extract_strided_slice %25 {offsets = [0, 128], sizes = [8, 128], strides = [1, 1]} : vector<8x256xf32> to vector<8x128xf32>
    %cst_24 = arith.constant dense<0.000000e+00> : vector<8x128xf32>
    %28 = tpu.matmul %1, %26, %cst_24 {dimension_numbers = #tpu.dot_dimension_numbers<[1], [0], [0], [1], [0, 0, 1, 1], [], []>} : vector<8x8xf32>, vector<8x128xf32>, vector<8x128xf32> -> vector<8x128xf32>
    %29 = arith.addf %28, %18 : vector<8x128xf32>
    %cst_25 = arith.constant dense<0.000000e+00> : vector<8x128xf32>
    %30 = tpu.matmul %3, %27, %cst_25 {dimension_numbers = #tpu.dot_dimension_numbers<[1], [0], [0], [1], [0, 0, 1, 1], [], []>} : vector<8x8xf32>, vector<8x128xf32>, vector<8x128xf32> -> vector<8x128xf32>
    %31 = arith.addf %30, %21 : vector<8x128xf32>
    %32 = tpu.concatenate %29, %31 in 1 : vector<8x128xf32>, vector<8x128xf32> -> vector<8x256xf32>
    %cst_26 = arith.constant dense<0.000000e+00> : vector<8x384xf32>
    %33 = tpu.matmul %32, %5, %cst_26 {dimension_numbers = #tpu.dot_dimension_numbers<[1], [0], [0], [1], [0, 0, 1, 1], [], []>} : vector<8x256xf32>, vector<256x384xf32>, vector<8x384xf32> -> vector<8x384xf32>
    %34 = arith.addf %33, %12 : vector<8x384xf32>
    %cst_27 = arith.constant dense<0.000000e+00> : vector<8x384xf32>
    %35 = tpu.matmul %23, %6, %cst_27 {dimension_numbers = #tpu.dot_dimension_numbers<[1], [0], [0], [1], [0, 0, 1, 1], [], []>} : vector<8x128xf32>, vector<128x384xf32>, vector<8x384xf32> -> vector<8x384xf32>
    %36 = arith.addf %35, %15 : vector<8x384xf32>
    %37 = vector.extract_strided_slice %34 {offsets = [0, 0], sizes = [8, 128], strides = [1, 1]} : vector<8x384xf32> to vector<8x128xf32>
    %38 = vector.extract_strided_slice %34 {offsets = [0, 128], sizes = [8, 128], strides = [1, 1]} : vector<8x384xf32> to vector<8x128xf32>
    %39 = vector.extract_strided_slice %34 {offsets = [0, 256], sizes = [8, 128], strides = [1, 1]} : vector<8x384xf32> to vector<8x128xf32>
    %40 = vector.extract_strided_slice %36 {offsets = [0, 0], sizes = [8, 128], strides = [1, 1]} : vector<8x384xf32> to vector<8x128xf32>
    %41 = vector.extract_strided_slice %36 {offsets = [0, 128], sizes = [8, 128], strides = [1, 1]} : vector<8x384xf32> to vector<8x128xf32>
    %42 = vector.extract_strided_slice %36 {offsets = [0, 256], sizes = [8, 128], strides = [1, 1]} : vector<8x384xf32> to vector<8x128xf32>
    %43 = arith.addf %37, %40 : vector<8x128xf32>
    %44 = arith.negf %43 : vector<8x128xf32>
    %45 = math.exp %44 : vector<8x128xf32>
    %cst_28 = arith.constant 1.000000e+00 : f32
    %46 = vector.broadcast %cst_28 : f32 to vector<8x128xf32>
    %47 = arith.addf %46, %45 : vector<8x128xf32>
    %48 = arith.divf %46, %47 : vector<8x128xf32>
    %49 = arith.addf %38, %41 : vector<8x128xf32>
    %50 = arith.negf %49 : vector<8x128xf32>
    %51 = math.exp %50 : vector<8x128xf32>
    %cst_29 = arith.constant 1.000000e+00 : f32
    %52 = vector.broadcast %cst_29 : f32 to vector<8x128xf32>
    %53 = arith.addf %52, %51 : vector<8x128xf32>
    %54 = arith.divf %52, %53 : vector<8x128xf32>
    %55 = arith.mulf %48, %42 : vector<8x128xf32>
    %56 = arith.addf %39, %55 : vector<8x128xf32>
    %57 = math.tanh %56 : vector<8x128xf32>
    %58 = arith.subf %23, %57 : vector<8x128xf32>
    %59 = arith.mulf %54, %58 : vector<8x128xf32>
    %60 = arith.addf %57, %59 : vector<8x128xf32>
    %61 = vector.shape_cast %60 : vector<8x128xf32> to vector<1x8x128xf32>
    %c0_30 = arith.constant 0 : index
    %c0_31 = arith.constant 0 : index
    %c0_32 = arith.constant 0 : index
    %62 = vector.load %arg12[%c0_30, %c0_31, %c0_32] : memref<1x8x128xf32, #tpu.memory_space<vmem>>, vector<1x8x128xf32>
    tpu.vector_store %arg12[%c0_30, %c0_31, %c0_32], %61 {strides = array<i32>} : memref<1x8x128xf32, #tpu.memory_space<vmem>>, vector<1x8x128xf32>,
    return
  }
  func.func @transform_0(%arg0: i32) -> (i32, i32, i32) {
    %c0_i32 = arith.constant 0 : i32
    %c0_i32_0 = arith.constant 0 : i32
    %c0_i32_1 = arith.constant 0 : i32
    return %arg0, %c0_i32, %c0_i32_0 : i32, i32, i32
  }
  func.func @transform_1(%arg0: i32) -> (i32, i32, i32) {
    %c0_i32 = arith.constant 0 : i32
    %c0_i32_0 = arith.constant 0 : i32
    %c0_i32_1 = arith.constant 0 : i32
    return %arg0, %c0_i32, %c0_i32_0 : i32, i32, i32
  }
  func.func @transform_2(%arg0: i32) -> (i32, i32, i32) {
    %c0_i32 = arith.constant 0 : i32
    %c0_i32_0 = arith.constant 0 : i32
    %c0_i32_1 = arith.constant 0 : i32
    return %arg0, %c0_i32, %c0_i32_0 : i32, i32, i32
  }
  func.func @transform_3(%arg0: i32) -> (i32, i32) {
    %c0_i32 = arith.constant 0 : i32
    %c0_i32_0 = arith.constant 0 : i32
    %c0_i32_1 = arith.constant 0 : i32
    return %c0_i32, %c0_i32_0 : i32, i32
  }
  func.func @transform_4(%arg0: i32) -> (i32, i32) {
    %c0_i32 = arith.constant 0 : i32
    %c0_i32_0 = arith.constant 0 : i32
    %c0_i32_1 = arith.constant 0 : i32
    return %c0_i32, %c0_i32_0 : i32, i32
  }
  func.func @transform_5(%arg0: i32) -> (i32, i32) {
    %c0_i32 = arith.constant 0 : i32
    %c0_i32_0 = arith.constant 0 : i32
    %c0_i32_1 = arith.constant 0 : i32
    return %c0_i32, %c0_i32_0 : i32, i32
  }
  func.func @transform_6(%arg0: i32) -> (i32, i32) {
    %c0_i32 = arith.constant 0 : i32
    %c0_i32_0 = arith.constant 0 : i32
    %c0_i32_1 = arith.constant 0 : i32
    return %c0_i32, %c0_i32_0 : i32, i32
  }
  func.func @transform_7(%arg0: i32) -> (i32, i32) {
    %c0_i32 = arith.constant 0 : i32
    %c0_i32_0 = arith.constant 0 : i32
    %c0_i32_1 = arith.constant 0 : i32
    return %c0_i32, %c0_i32_0 : i32, i32
  }
  func.func @transform_8(%arg0: i32) -> (i32, i32) {
    %c0_i32 = arith.constant 0 : i32
    %c0_i32_0 = arith.constant 0 : i32
    %c0_i32_1 = arith.constant 0 : i32
    return %c0_i32, %c0_i32_0 : i32, i32
  }
  func.func @transform_9(%arg0: i32) -> (i32, i32) {
    %c0_i32 = arith.constant 0 : i32
    %c0_i32_0 = arith.constant 0 : i32
    %c0_i32_1 = arith.constant 0 : i32
    return %c0_i32, %c0_i32_0 : i32, i32
  }
  func.func @transform_10(%arg0: i32) -> (i32, i32) {
    %c0_i32 = arith.constant 0 : i32
    %c0_i32_0 = arith.constant 0 : i32
    %c0_i32_1 = arith.constant 0 : i32
    return %c0_i32, %c0_i32_0 : i32, i32
  }
  func.func @transform_11(%arg0: i32) -> (i32, i32, i32) {
    %c0_i32 = arith.constant 0 : i32
    %c0_i32_0 = arith.constant 0 : i32
    %c0_i32_1 = arith.constant 0 : i32
    return %arg0, %c0_i32, %c0_i32_0 : i32, i32, i32
  }
}

module attributes {stable_mosaic.version = 11 : i64} {
  func.func @_gnn_fused_kernel(%arg0: i32, %arg1: memref<1x8x8xf32, #tpu.memory_space<vmem>>, %arg2: memref<1x8x8xf32, #tpu.memory_space<vmem>>, %arg3: memref<1x8x128xf32, #tpu.memory_space<vmem>>, %arg4: memref<128x256xf32, #tpu.memory_space<vmem>>, %arg5: memref<1x256xf32, #tpu.memory_space<vmem>>, %arg6: memref<256x384xf32, #tpu.memory_space<vmem>>, %arg7: memref<1x384xf32, #tpu.memory_space<vmem>>, %arg8: memref<128x384xf32, #tpu.memory_space<vmem>>, %arg9: memref<1x384xf32, #tpu.memory_space<vmem>>, %arg10: memref<1x128xf32, #tpu.memory_space<vmem>>, %arg11: memref<1x128xf32, #tpu.memory_space<vmem>>, %arg12: memref<1x8x128xf32, #tpu.memory_space<vmem>>) attributes {dimension_semantics = [#tpu.dimension_semantics<parallel>], iteration_bounds = array<i64: 2>, scalar_prefetch = 0 : i64, scratch_operands = 0 : i64, tpu.core_type = #tpu.core_type<tc>, window_params = [{transform_indices = @transform_0, window_bounds = array<i64: 1, 8, 8>}, {transform_indices = @transform_1, window_bounds = array<i64: 1, 8, 8>}, {transform_indices = @transform_2, window_bounds = array<i64: 1, 8, 128>}, {pipeline_mode = #tpu.pipeline_mode<synchronous>, transform_indices = @transform_3, window_bounds = array<i64: 128, 256>}, {pipeline_mode = #tpu.pipeline_mode<synchronous>, transform_indices = @transform_4, window_bounds = array<i64: 1, 256>}, {pipeline_mode = #tpu.pipeline_mode<synchronous>, transform_indices = @transform_5, window_bounds = array<i64: 256, 384>}, {pipeline_mode = #tpu.pipeline_mode<synchronous>, transform_indices = @transform_6, window_bounds = array<i64: 1, 384>}, {pipeline_mode = #tpu.pipeline_mode<synchronous>, transform_indices = @transform_7, window_bounds = array<i64: 128, 384>}, {pipeline_mode = #tpu.pipeline_mode<synchronous>, transform_indices = @transform_8, window_bounds = array<i64: 1, 384>}, {pipeline_mode = #tpu.pipeline_mode<synchronous>, transform_indices = @transform_9, window_bounds = array<i64: 1, 128>}, {pipeline_mode = #tpu.pipeline_mode<synchronous>, transform_indices = @transform_10, window_bounds = array<i64: 1, 128>}, {transform_indices = @transform_11, window_bounds = array<i64: 1, 8, 128>}]} {
    %c0 = arith.constant 0 : index
    %c0_0 = arith.constant 0 : index
    %c0_1 = arith.constant 0 : index
    %0 = vector.load %arg1[%c0, %c0_0, %c0_1] : memref<1x8x8xf32, #tpu.memory_space<vmem>>, vector<1x8x8xf32>
    %1 = vector.shape_cast %0 : vector<1x8x8xf32> to vector<8x8xf32>
    %c0_2 = arith.constant 0 : index
    %c0_3 = arith.constant 0 : index
    %c0_4 = arith.constant 0 : index
    %2 = vector.load %arg2[%c0_2, %c0_3, %c0_4] : memref<1x8x8xf32, #tpu.memory_space<vmem>>, vector<1x8x8xf32>
    %3 = vector.shape_cast %2 : vector<1x8x8xf32> to vector<8x8xf32>
    %c0_5 = arith.constant 0 : index
    %c0_6 = arith.constant 0 : index
    %4 = vector.load %arg4[%c0_5, %c0_6] : memref<128x256xf32, #tpu.memory_space<vmem>>, vector<128x256xf32>
    %c0_7 = arith.constant 0 : index
    %c0_8 = arith.constant 0 : index
    %5 = vector.load %arg6[%c0_7, %c0_8] : memref<256x384xf32, #tpu.memory_space<vmem>>, vector<256x384xf32>
    %c0_9 = arith.constant 0 : index
    %c0_10 = arith.constant 0 : index
    %6 = vector.load %arg8[%c0_9, %c0_10] : memref<128x384xf32, #tpu.memory_space<vmem>>, vector<128x384xf32>
    %c0_11 = arith.constant 0 : index
    %c0_12 = arith.constant 0 : index
    %7 = vector.load %arg5[%c0_11, %c0_12] : memref<1x256xf32, #tpu.memory_space<vmem>>, vector<1x256xf32>
    %8 = vector.shape_cast %7 : vector<1x256xf32> to vector<1x256xf32>
    %9 = vector.broadcast %8 : vector<1x256xf32> to vector<8x256xf32>
    %c0_13 = arith.constant 0 : index
    %c0_14 = arith.constant 0 : index
    %10 = vector.load %arg7[%c0_13, %c0_14] : memref<1x384xf32, #tpu.memory_space<vmem>>, vector<1x384xf32>
    %11 = vector.shape_cast %10 : vector<1x384xf32> to vector<1x384xf32>
    %12 = vector.broadcast %11 : vector<1x384xf32> to vector<8x384xf32>
    %c0_15 = arith.constant 0 : index
    %c0_16 = arith.constant 0 : index
    %13 = vector.load %arg9[%c0_15, %c0_16] : memref<1x384xf32, #tpu.memory_space<vmem>>, vector<1x384xf32>
    %14 = vector.shape_cast %13 : vector<1x384xf32> to vector<1x384xf32>
    %15 = vector.broadcast %14 : vector<1x384xf32> to vector<8x384xf32>
    %c0_17 = arith.constant 0 : index
    %c0_18 = arith.constant 0 : index
    %16 = vector.load %arg10[%c0_17, %c0_18] : memref<1x128xf32, #tpu.memory_space<vmem>>, vector<1x128xf32>
    %17 = vector.shape_cast %16 : vector<1x128xf32> to vector<1x128xf32>
    %18 = vector.broadcast %17 : vector<1x128xf32> to vector<8x128xf32>
    %c0_19 = arith.constant 0 : index
    %c0_20 = arith.constant 0 : index
    %19 = vector.load %arg11[%c0_19, %c0_20] : memref<1x128xf32, #tpu.memory_space<vmem>>, vector<1x128xf32>
    %20 = vector.shape_cast %19 : vector<1x128xf32> to vector<1x128xf32>
    %21 = vector.broadcast %20 : vector<1x128xf32> to vector<8x128xf32>
    %c0_21 = arith.constant 0 : index
    %c0_22 = arith.constant 0 : index
    %c0_23 = arith.constant 0 : index
    %22 = vector.load %arg3[%c0_21, %c0_22, %c0_23] : memref<1x8x128xf32, #tpu.memory_space<vmem>>, vector<1x8x128xf32>
    %23 = vector.shape_cast %22 : vector<1x8x128xf32> to vector<8x128xf32>
    %cst = arith.constant dense<0.000000e+00> : vector<8x256xf32>
    %24 = tpu.matmul %23, %4, %cst {dimension_numbers = #tpu.dot_dimension_numbers<[1], [0], [0], [1], [0, 0, 1, 1], [], []>} : vector<8x128xf32>, vector<128x256xf32>, vector<8x256xf32> -> vector<8x256xf32>
    %25 = arith.addf %24, %9 : vector<8x256xf32>
    %26 = vector.extract_strided_slice %25 {offsets = [0, 0], sizes = [8, 128], strides = [1, 1]} : vector<8x256xf32> to vector<8x128xf32>
    %27 = vector.extract_strided_slice %25 {offsets = [0, 128], sizes = [8, 128], strides = [1, 1]} : vector<8x256xf32> to vector<8x128xf32>
    %cst_24 = arith.constant dense<0.000000e+00> : vector<8x128xf32>
    %28 = tpu.matmul %1, %26, %cst_24 {dimension_numbers = #tpu.dot_dimension_numbers<[1], [0], [0], [1], [0, 0, 1, 1], [], []>} : vector<8x8xf32>, vector<8x128xf32>, vector<8x128xf32> -> vector<8x128xf32>
    %29 = arith.addf %28, %18 : vector<8x128xf32>
    %cst_25 = arith.constant dense<0.000000e+00> : vector<8x128xf32>
    %30 = tpu.matmul %3, %27, %cst_25 {dimension_numbers = #tpu.dot_dimension_numbers<[1], [0], [0], [1], [0, 0, 1, 1], [], []>} : vector<8x8xf32>, vector<8x128xf32>, vector<8x128xf32> -> vector<8x128xf32>
    %31 = arith.addf %30, %21 : vector<8x128xf32>
    %32 = tpu.concatenate %29, %31 in 1 : vector<8x128xf32>, vector<8x128xf32> -> vector<8x256xf32>
    %cst_26 = arith.constant dense<0.000000e+00> : vector<8x384xf32>
    %33 = tpu.matmul %32, %5, %cst_26 {dimension_numbers = #tpu.dot_dimension_numbers<[1], [0], [0], [1], [0, 0, 1, 1], [], []>} : vector<8x256xf32>, vector<256x384xf32>, vector<8x384xf32> -> vector<8x384xf32>
    %34 = arith.addf %33, %12 : vector<8x384xf32>
    %cst_27 = arith.constant dense<0.000000e+00> : vector<8x384xf32>
    %35 = tpu.matmul %23, %6, %cst_27 {dimension_numbers = #tpu.dot_dimension_numbers<[1], [0], [0], [1], [0, 0, 1, 1], [], []>} : vector<8x128xf32>, vector<128x384xf32>, vector<8x384xf32> -> vector<8x384xf32>
    %36 = arith.addf %35, %15 : vector<8x384xf32>
    %37 = vector.extract_strided_slice %34 {offsets = [0, 0], sizes = [8, 128], strides = [1, 1]} : vector<8x384xf32> to vector<8x128xf32>
    %38 = vector.extract_strided_slice %34 {offsets = [0, 128], sizes = [8, 128], strides = [1, 1]} : vector<8x384xf32> to vector<8x128xf32>
    %39 = vector.extract_strided_slice %34 {offsets = [0, 256], sizes = [8, 128], strides = [1, 1]} : vector<8x384xf32> to vector<8x128xf32>
    %40 = vector.extract_strided_slice %36 {offsets = [0, 0], sizes = [8, 128], strides = [1, 1]} : vector<8x384xf32> to vector<8x128xf32>
    %41 = vector.extract_strided_slice %36 {offsets = [0, 128], sizes = [8, 128], strides = [1, 1]} : vector<8x384xf32> to vector<8x128xf32>
    %42 = vector.extract_strided_slice %36 {offsets = [0, 256], sizes = [8, 128], strides = [1, 1]} : vector<8x384xf32> to vector<8x128xf32>
    %43 = arith.addf %37, %40 : vector<8x128xf32>
    %44 = arith.negf %43 : vector<8x128xf32>
    %45 = math.exp %44 : vector<8x128xf32>
    %cst_28 = arith.constant 1.000000e+00 : f32
    %46 = vector.broadcast %cst_28 : f32 to vector<8x128xf32>
    %47 = arith.addf %46, %45 : vector<8x128xf32>
    %48 = arith.divf %46, %47 : vector<8x128xf32>
    %49 = arith.addf %38, %41 : vector<8x128xf32>
    %50 = arith.negf %49 : vector<8x128xf32>
    %51 = math.exp %50 : vector<8x128xf32>
    %cst_29 = arith.constant 1.000000e+00 : f32
    %52 = vector.broadcast %cst_29 : f32 to vector<8x128xf32>
    %53 = arith.addf %52, %51 : vector<8x128xf32>
    %54 = arith.divf %52, %53 : vector<8x128xf32>
    %55 = arith.mulf %48, %42 : vector<8x128xf32>
    %56 = arith.addf %39, %55 : vector<8x128xf32>
    %57 = math.tanh %56 : vector<8x128xf32>
    %58 = arith.subf %23, %57 : vector<8x128xf32>
    %59 = arith.mulf %54, %58 : vector<8x128xf32>
    %60 = arith.addf %57, %59 : vector<8x128xf32>
    %61 = vector.shape_cast %60 : vector<8x128xf32> to vector<1x8x128xf32>
    %c0_30 = arith.constant 0 : index
    %c0_31 = arith.constant 0 : index
    %c0_32 = arith.constant 0 : index
    %62 = vector.load %arg12[%c0_30, %c0_31, %c0_32] : memref<1x8x128xf32, #tpu.memory_space<vmem>>, vector<1x8x128xf32>
    tpu.vector_store %arg12[%c0_30, %c0_31, %c0_32], %61 {strides = array<i32>} : memref<1x8x128xf32, #tpu.memory_space<vmem>>, vector<1x8x128xf32>,
    return
  }
  func.func @transform_0(%arg0: i32) -> (i32, i32, i32) {
    %c0_i32 = arith.constant 0 : i32
    %c0_i32_0 = arith.constant 0 : i32
    %c0_i32_1 = arith.constant 0 : i32
    return %arg0, %c0_i32, %c0_i32_0 : i32, i32, i32
  }
  func.func @transform_1(%arg0: i32) -> (i32, i32, i32) {
    %c0_i32 = arith.constant 0 : i32
    %c0_i32_0 = arith.constant 0 : i32
    %c0_i32_1 = arith.constant 0 : i32
    return %arg0, %c0_i32, %c0_i32_0 : i32, i32, i32
  }
  func.func @transform_2(%arg0: i32) -> (i32, i32, i32) {
    %c0_i32 = arith.constant 0 : i32
    %c0_i32_0 = arith.constant 0 : i32
    %c0_i32_1 = arith.constant 0 : i32
    return %arg0, %c0_i32, %c0_i32_0 : i32, i32, i32
  }
  func.func @transform_3(%arg0: i32) -> (i32, i32) {
    %c0_i32 = arith.constant 0 : i32
    %c0_i32_0 = arith.constant 0 : i32
    %c0_i32_1 = arith.constant 0 : i32
    return %c0_i32, %c0_i32_0 : i32, i32
  }
  func.func @transform_4(%arg0: i32) -> (i32, i32) {
    %c0_i32 = arith.constant 0 : i32
    %c0_i32_0 = arith.constant 0 : i32
    %c0_i32_1 = arith.constant 0 : i32
    return %c0_i32, %c0_i32_0 : i32, i32
  }
  func.func @transform_5(%arg0: i32) -> (i32, i32) {
    %c0_i32 = arith.constant 0 : i32
    %c0_i32_0 = arith.constant 0 : i32
    %c0_i32_1 = arith.constant 0 : i32
    return %c0_i32, %c0_i32_0 : i32, i32
  }
  func.func @transform_6(%arg0: i32) -> (i32, i32) {
    %c0_i32 = arith.constant 0 : i32
    %c0_i32_0 = arith.constant 0 : i32
    %c0_i32_1 = arith.constant 0 : i32
    return %c0_i32, %c0_i32_0 : i32, i32
  }
  func.func @transform_7(%arg0: i32) -> (i32, i32) {
    %c0_i32 = arith.constant 0 : i32
    %c0_i32_0 = arith.constant 0 : i32
    %c0_i32_1 = arith.constant 0 : i32
    return %c0_i32, %c0_i32_0 : i32, i32
  }
  func.func @transform_8(%arg0: i32) -> (i32, i32) {
    %c0_i32 = arith.constant 0 : i32
    %c0_i32_0 = arith.constant 0 : i32
    %c0_i32_1 = arith.constant 0 : i32
    return %c0_i32, %c0_i32_0 : i32, i32
  }
  func.func @transform_9(%arg0: i32) -> (i32, i32) {
    %c0_i32 = arith.constant 0 : i32
    %c0_i32_0 = arith.constant 0 : i32
    %c0_i32_1 = arith.constant 0 : i32
    return %c0_i32, %c0_i32_0 : i32, i32
  }
  func.func @transform_10(%arg0: i32) -> (i32, i32) {
    %c0_i32 = arith.constant 0 : i32
    %c0_i32_0 = arith.constant 0 : i32
    %c0_i32_1 = arith.constant 0 : i32
    return %c0_i32, %c0_i32_0 : i32, i32
  }
  func.func @transform_11(%arg0: i32) -> (i32, i32, i32) {
    %c0_i32 = arith.constant 0 : i32
    %c0_i32_0 = arith.constant 0 : i32
    %c0_i32_1 = arith.constant 0 : i32
    return %arg0, %c0_i32, %c0_i32_0 : i32, i32, i32
  }
}

</mosaic_0001>

<bundles_post_ra>
// kernel: tpu_custom_call.1
= control target key start
LH: loop header
LB: loop body
LE: loop exit
PB: predicated region body
PF: predicated region fallthrough
CT: control target
= control target key end

     0   :  { %s2327_s0 = inlined_call_operand.vmem [shape: f32[2,8,8], index: 0, kind: input, shape index: {}]   ;;  %s2328_s1 = inlined_call_operand.vmem [shape: f32[2,8,8], index: 1, kind: input, shape index: {}]   ;;  %s2329_s2 = inlined_call_operand.hbm [shape: f32[2,8,128], index: 2, kind: input, shape index: {}, may-alias: {2,11}]   ;;  %s2330_s3 = inlined_call_operand.hbm [shape: f32[128,256], index: 3, kind: input, shape index: {}]   ;;  %s2331_s4 = inlined_call_operand.vmem [shape: f32[1,256], index: 4, kind: input, shape index: {}]   ;;  %s2332_s5 = inlined_call_operand.hbm [shape: f32[256,384], index: 5, kind: input, shape index: {}]   ;;  %s2333_s6 = inlined_call_operand.vmem [shape: f32[1,384], index: 6, kind: input, shape index: {}]   ;;  %s2334_s7 = inlined_call_operand.hbm [shape: f32[128,384], index: 7, kind: input, shape index: {}]   ;;  %s2335_s8 = inlined_call_operand.hbm [shape: f32[1,384], index: 8, kind: input, shape index: {}]   ;;  %s2336_s9 = inlined_call_operand.hbm [shape: f32[1,128], index: 9, kind: input, shape index: {}]   ;;  %s2337_s10 = inlined_call_operand.hbm [shape: f32[1,128], index: 10, kind: input, shape index: {}]   ;;  %s2338_s11 = inlined_call_operand.hbm [shape: f32[2,8,128], index: 11, kind: output, shape index: {}, may-alias: {2,11}]  }
   0x1   :  { %2344 = sst [smem:[#allocation20_spill]] %s2330_s3 }
   0x2   :  { %2345 = sst [smem:[#allocation21_spill]] %s2332_s5 }
   0x3   :  { %2346 = sst [smem:[#allocation22_spill]] %s2334_s7 }
   0x4   :  { %2347 = sst [smem:[#allocation23_spill]] %s2335_s8 }
   0x5   :  { %2348 = sst [smem:[#allocation24_spill]] %s2336_s9 }
   0x6   :  { %2349 = sst [smem:[#allocation25_spill]] %s2337_s10 }
   0x7   :  { %16 = vsyncpa [#allocation3], 0 }
   0x8   :  { %18 = vsyncpa [#allocation3 + $0x1], 0 }
   0x9   :  { %19 = vsyncpa [#allocation6], 0 }
   0xa   :  { %20 = vsyncpa [#allocation9], 0 }
   0xb   :  { %21 = vsyncpa [#allocation12], 0 }
   0xc   :  { %22 = vsyncpa [#allocation4], 0 }
   0xd   :  { %24 = vsyncpa [#allocation4 + $0x1], 0  ;;  %s2034_s17 = smov 0   ;;  %s2036_s18 = smov 0  }
   0xe   :  { %s2038_s19 = smov 0   ;;  %s2040_s20 = smov 0  }
   0xf LB: > { %s1960_s21 = smov [#allocation5]   ;;  %s2055_s23 = sadd.s32 4294967295, %s1958_s20   ;;  %s1958_s20 = sphi %s2040_s20, %s2379_s20   ;;  %s1954_s19 = sphi %s2038_s19, %s2378_s19   ;;  %s1950_s18 = sphi %s2036_s18, %s2377_s18   ;;  %s1946_s17 = sphi %s2034_s17, %s2376_s17  }
  0x10   : > { %s319_s22 = sshll.u32 %s1960_s21, 4  ;;  %p1443_p0 = scmp.ge.s32.totalorder %s1958_s20, 1  ;;  %s320_s22 = int_to_ptr.vmem [resolvable:$true] %s319_s22 }
  0x11   : > { %p2340_p1 = scmp.eq.s32.totalorder %s2055_s23, 0  ;;  %p307_p2 = scmp.lt.s32.totalorder %s1958_s20, 3 }
  0x12   : > { %s1961_s26 = smov [#allocation8]   ;;  %s1962_s28 = smov [#allocation11]  }
  0x13   : > { %p2060_p3 = pnand %p1443_p0, %p307_p2  ;;  %s351_s27 = sshll.u32 %s1961_s26, 4  ;;  %s2073_s27 = int_to_ptr.vmem [resolvable:$true] %s351_s27 }
  0x14   : > { %s2075_s29 = sshll.u32 %s1962_s28, 4  ;;  %s1709_s12 = scalar_lea.vmem %s320_s22, 4096  ;;  %s377_s29 = int_to_ptr.vmem [resolvable:$true] %s2075_s29 }
  0x15   : > { %s2350_s24 = scalar_select %p2060_p3, 1, 0 }
  0x16   : > { %p1603_p5 = pneg %p2060_p3  ;;  %p1710_p8 = scmp.ne.s32.totalorder %s320_s22, %s1709_s12 }
  0x17   : > { %p1717_p11 = scmp.lt.s32.totalorder %s320_s22, %s320_s22  ;;  %p1718_p12 = scmp.lt.s32.totalorder %s1709_s12, %s1709_s12 }
  0x18   : > { %p2069_p6 = pnand %p1603_p5, %p2340_p1 }
  0x19   : > { %p1719_p13 = por %p1718_p12, %p1717_p11 }
  0x1a   : > { %p2079_p7 = pneg %p2069_p6 }
  0x1c   : > { %p1712_p9 = pnand %p1710_p8, %p2079_p7 }
  0x1e   : > { %p1713_p10 = pneg %p1712_p9 }
  0x20   : > { %p1720_p0 = pnand %p1719_p13, %p1713_p10 }
  0x22   : > { %1723 = shalt.err (!%p1720_p0)
}
  0x23   : > { %s1963_s13 = smov 256   ;;  %s1964_s14 = smov 16  }
  0x24   : > { %s2353_s3 = sld [smem:[#allocation20_spill]]  ;;  %s1735_s21 = scalar_lea.vmem %s2073_s27, 6144 }
  0x25   : > { %p1736_p2 = scmp.ne.s32.totalorder %s2073_s27, %s1735_s21  ;;  %p1743_p9 = scmp.lt.s32.totalorder %s2073_s27, %s2073_s27 }
  0x26   : > { %p1744_p10 = scmp.lt.s32.totalorder %s1735_s21, %s1735_s21 }
  0x27   : > { %p1738_p5 = pnand %p1736_p2, %p2079_p7 }
  0x28   : > { %p1745_p11 = por %p1744_p10, %p1743_p9 }
  0x29   : > { %p1739_p8 = pneg %p1738_p5 }
  0x2a   : > { %1606 = dma.hbm_to_vmem [thread:$0]  (!%p2069_p6), %s2353_s3, 4096, %s320_s22, [#allocation6], %s1963_s13, %s1963_s13, %s1964_s14  }
  0x2b   : > { %p1746_p12 = pnand %p1745_p11, %p1739_p8 }
  0x2d   : > { %1749 = shalt.err (!%p1746_p12)
}
  0x2e   : > { %s2339_s26 = smov 384   ;;  %s1966_s28 = smov 24  }
  0x2f   : > { %s2354_s7 = sld [smem:[#allocation22_spill]]  ;;  %s1761_s13 = scalar_lea.vmem %s377_s29, 16 }
  0x30   : > { %p1762_p13 = scmp.ne.s32.totalorder %s377_s29, %s1761_s13  ;;  %s1768_s14 = scalar_lea.vmem %s377_s29, 32 }
  0x31   : > { %p1769_p5 = scmp.lt.s32.totalorder %s377_s29, %s377_s29  ;;  %p1770_p8 = scmp.lt.s32.totalorder %s1768_s14, %s1761_s13 }
  0x32   : > { %p1764_p0 = pnand %p1762_p13, %p2079_p7 }
  0x33   : > { %p1771_p9 = por %p1770_p8, %p1769_p5 }
  0x34   : > { %p1765_p2 = pneg %p1764_p0 }
  0x35   : > { %1612 = dma.hbm_to_vmem [thread:$0]  (!%p2069_p6), %s2354_s7, 6144, %s2073_s27, [#allocation9], %s2339_s26, %s2339_s26, %s1966_s28  }
  0x36   : > { %p1772_p10 = pnand %p1771_p9, %p1765_p2 }
  0x38   : > { %1775 = shalt.err (!%p1772_p10)
}
  0x39   : > { %s2355_s9 = sld [smem:[#allocation24_spill]]  ;;  %s1967_s27 = smov [#allocation7]  }
  0x3a   : > { %s335_s21 = sshll.u32 %s1967_s27, 4  ;;  %s1968_s22 = smov [#allocation10]   ;;  %s336_s21 = int_to_ptr.vmem [resolvable:$true] %s335_s21 }
  0x3b   : > { %s365_s12 = sshll.u32 %s1968_s22, 4  ;;  %s1787_s26 = scalar_lea.vmem %s336_s21, 12288  ;;  %s366_s12 = int_to_ptr.vmem [resolvable:$true] %s365_s12 }
  0x3c   : > { %p1788_p11 = scmp.ne.s32.totalorder %s336_s21, %s1787_s26  ;;  %p1795_p0 = scmp.lt.s32.totalorder %s336_s21, %s336_s21 }
  0x3d   : > { %p1796_p2 = scmp.lt.s32.totalorder %s1787_s26, %s1787_s26 }
  0x3e   : > { %p1790_p12 = pnand %p1788_p11, %p2079_p7 }
  0x3f   : > { %1618 = dma.hbm_to_vmem [thread:$0]  (!%p2069_p6), %s2355_s9, 16, %s377_s29, [#allocation12]  }
  0x40   : > { %p1791_p13 = pneg %p1790_p12  ;;  %p1797_p5 = por %p1796_p2, %p1795_p0 }
  0x42   : > { %p1798_p8 = pnand %p1797_p5, %p1791_p13 }
  0x44   : > { %1801 = shalt.err (!%p1798_p8)
}
  0x45   : > { %s2356_s13 = smov 384   ;;  %s2357_s5 = sld [smem:[#allocation21_spill]] }
  0x46   : > { %s1813_s15 = scalar_lea.vmem %s366_s12, 48  ;;  %s1820_s26 = scalar_lea.vmem %s366_s12, 64 }
  0x47   : > { %p1814_p9 = scmp.ne.s32.totalorder %s366_s12, %s1813_s15  ;;  %p1821_p12 = scmp.lt.s32.totalorder %s366_s12, %s366_s12 }
  0x48   : > { %p1822_p13 = scmp.lt.s32.totalorder %s1820_s26, %s1813_s15 }
  0x49   : > { %p1816_p10 = pnand %p1814_p9, %p2079_p7 }
  0x4a   : > { %p1823_p0 = por %p1822_p13, %p1821_p12 }
  0x4b   : > { %1609 = dma.hbm_to_vmem [thread:$0]  (!%p2069_p6), %s2357_s5, 12288, %s336_s21, [#allocation6], %s2356_s13, %s2356_s13, %s1966_s28  }
  0x4c   : > { %p1817_p11 = pneg %p1816_p10 }
  0x4e   : > { %p1824_p2 = pnand %p1823_p0, %p1817_p11 }
  0x50   : > { %1827 = shalt.err (!%p1824_p2)
}
  0x51   : > { %s2358_s8 = sld [smem:[#allocation23_spill]]  ;;  %s1969_s28 = smov [#allocation13]  }
  0x52   : > { %s387_s21 = sshll.u32 %s1969_s28, 4  ;;  %s388_s21 = int_to_ptr.vmem [resolvable:$true] %s387_s21 }
  0x53   : > { %s1839_s22 = scalar_lea.vmem %s388_s21, 16  ;;  %s1846_s13 = scalar_lea.vmem %s388_s21, 32 }
  0x54   : > { %p1840_p5 = scmp.ne.s32.totalorder %s388_s21, %s1839_s22  ;;  %p1847_p10 = scmp.lt.s32.totalorder %s388_s21, %s388_s21 }
  0x55   : > { %p1848_p12 = scmp.lt.s32.totalorder %s1846_s13, %s1839_s22 }
  0x56   : > { %p1842_p8 = pnand %p1840_p5, %p2079_p7 }
  0x57   : > { %1615 = dma.hbm_to_vmem [thread:$0]  (!%p2069_p6), %s2358_s8, 48, %s366_s12, [#allocation9]  }
  0x58   : > { %p1843_p9 = pneg %p1842_p8  ;;  %p1849_p11 = por %p1848_p12, %p1847_p10 }
  0x5a   : > { %p1850_p13 = pnand %p1849_p11, %p1843_p9 }
  0x5c   : > { %1853 = shalt.err (!%p1850_p13)
}
  0x5d   : > { %s2359_s10 = sld [smem:[#allocation25_spill]]  ;;  %s1442_s30 = sadd.s32 4294967294, %s1958_s20  }
  0x5e   : > { %s2139_s25 = sadd.s32 1, %s1958_s20   ;;  %s89_s15 = sadd.s32 1, %s1954_s19 }
  0x5f   : > { %s86_s12 = ssub.s32 %s1958_s20, %s2139_s25  ;;  %p96_p0 = scmp.ne.s32.totalorder %s1954_s19, %s1950_s18 }
  0x60   : > { %p87_p7 = scmp.eq.s32.totalorder %s86_s12, 0  ;;  %p97_p2 = scmp.eq.s32.totalorder %s1958_s20, 0 }
  0x61   : > { %p102_p5 = scmp.ne.s32.totalorder %s1950_s18, %s1946_s17  ;;  %p294_p9 = scmp.eq.s32.totalorder %s2055_s23, 1 }
  0x62   : > { %s2150_s26 = scalar_select %p87_p7, %s1954_s19, %s89_s15  }
  0x63   : > { %1621 = dma.hbm_to_vmem [thread:$0]  (!%p2069_p6), %s2359_s10, 16, %s388_s21, [#allocation12]  }
  0x64   : > { %p2152_p8 = por %p97_p2, %p96_p0  ;;  %p2158_p6 = por %p2340_p1, %p102_p5 }
  0x65   : > { %p300_p10 = scmp.eq.s32.totalorder %s1442_s30, 1  ;;  %p1636_p12 = scmp.lt.s32.totalorder %s1958_s20, 2 }
  0x66   : > { %s2361_s27 = scalar_select %p2158_p6, 1, 0 }
  0x67   : > { %s412_s28 = sand.u32 1, %s1954_s19   ;;  %p2165_p11 = por %p294_p9, %p96_p0 }
  0x68   : > { %p2169_p13 = por %p300_p10, %p102_p5  ;;  %s1451_s13 = sshll.u32 %s412_s28, 3 }
  0x69   : > { %s2362_s21 = scalar_select %p2165_p11, 1, 0 }
  0x6a   : > { %s2363_s22 = scalar_select %p2169_p13, 1, 0 }
  0x6b   : > { %s1452_s29 = sshll.u32 %s1958_s20, 7  ;;  %s416_s30 = scalar_lea.vmem [#allocation2], %s1451_s13 }
  0x6c   : > { %s2177_s15 = scalar_lea.hbm %s2329_s2, %s1452_s29  ;;  %s423_s3 = sshll.u32 %s416_s30, 4  ;;  %s424_s3 = int_to_ptr.vmem [resolvable:$true] %s423_s3 }
  0x6d   : > { %p2181_p7 = pnand %p1636_p12, %p2152_p8  ;;  %s413_s7 = scalar_lea.sflag [#allocation3], %s412_s28 }
  0x6e   : > { %s1854_s8 = scalar_lea.hbm %s2177_s15, 128  ;;  %s1859_s12 = scalar_lea.hbm %s2329_s2, 256 }
  0x6f   : > { %p1855_p0 = scmp.ne.s32.totalorder %s2177_s15, %s1854_s8  ;;  %p1856_p2 = pneg %p2181_p7 }
  0x70   : > { %p1860_p10 = scmp.lt.s32.totalorder %s2177_s15, %s2329_s2  ;;  %p1861_p8 = scmp.lt.s32.totalorder %s1859_s12, %s1854_s8 }
  0x71   : > { %p1857_p5 = pnand %p1856_p2, %p1855_p0 }
  0x72   : > { %p1862_p12 = por %p1861_p8, %p1860_p10 }
  0x73   : > { %p1858_p9 = pneg %p1857_p5 }
  0x75   : > { %p1863_p4 = pnand %p1862_p12, %p1858_p9 }
  0x77   : > { %1866 = shalt.err (!%p1863_p4)
}
  0x78   : > { %s1867_s16 = scalar_lea.vmem %s424_s3, 128  ;;  %s1970_s28 = smov [#allocation2]  }
  0x79   : > { %p1868_p1 = scmp.ne.s32.totalorder %s424_s3, %s1867_s16  ;;  %s1872_s9 = sshll.u32 %s1970_s28, 4  ;;  %s1873_s9 = int_to_ptr.vmem [resolvable:$false] %s1872_s9 }
  0x7a   : > { %s1874_s10 = scalar_lea.vmem %s1873_s9, 256  ;;  %p1875_p0 = scmp.lt.s32.totalorder %s424_s3, %s1873_s9 }
  0x7b   : > { %p1870_p13 = pnand %p1868_p1, %p1856_p2  ;;  %p1876_p5 = scmp.lt.s32.totalorder %s1874_s10, %s1867_s16 }
  0x7d   : > { %p1871_p11 = pneg %p1870_p13  ;;  %p1877_p6 = por %p1876_p5, %p1875_p0 }
  0x7f   : > { %p1878_p3 = pnand %p1877_p6, %p1871_p11 }
  0x81   : > { %1881 = shalt.err (!%p1878_p3)
}
  0x82   : > { %1625 = dma.hbm_to_vmem [thread:$0]  (!%p2181_p7), %s2177_s15, 128, %s424_s3, %s413_s7  }
  0x83   : > { %p2365_p9 = scmp.ne.s32.totalorder %s2350_s24, 0 }
  0x84   : > { %s2202_s8 = sand.u32 (!%p2365_p9), 1, %s1950_s18   ;;  %p2366_p1 = scmp.ne.s32.totalorder (!%p2365_p9), %s2361_s27, 0 }
  0x85   : > { %432 = sbr.rel (%p2365_p9) target bundleno = 874 (0x36a), region = 64  ;;  %s1454_s29 = sshll.u32 (!%p2365_p9), %s2202_s8, 3 }
  0x86   : > { %s435_s9 = scalar_lea.sflag (!%p2365_p9), [#allocation3], %s2202_s8  ;;  %s2208_s10 = scalar_lea.vmem (!%p2365_p9), [#allocation2], %s1454_s29 }
  0x8a   : > { %1925 = dma.done.wait (%p2366_p1), %s435_s9, 128  }
  0x8b   : > { %1927 = vsyncadd (%p2366_p1), %s435_s9, 4294967168  ;;  %p2367_p3 = scmp.eq.s32.totalorder %s2055_s23, 0 }
  0x8d   : > { %1929 = dma.done.wait (%p2367_p3), [#allocation6], 16384   ;;  %p2368_p4 = pmov %p2367_p3 }
  0x8e   : > { %p2369_p6 = pmov %p2367_p3 }
  0x8f   : > { %1931 = vsyncadd (%p2368_p4), [#allocation6], 4294950912 }
  0x90   : > { %1933 = dma.done.wait (%p2369_p6), [#allocation9], 6192   ;;  %p2370_p11 = pmov %p2367_p3 }
  0x91   : > { %p2371_p13 = pmov %p2367_p3 }
  0x92   : > { %1935 = vsyncadd (%p2370_p11), [#allocation9], 4294961104 }
  0x93   : > { %1937 = dma.done.wait (%p2371_p13), [#allocation12], 32   ;;  %p2372_p7 = pmov %p2367_p3 }
  0x94   : > { %v1971_v0 = vmov 0.0   ;;  %v550_v1 = vld [vmem:[#allocation5 + $0xf8] sm:$0xff]  ;;  %v549_v2 = vld [vmem:[#allocation5 + $0xf0] sm:$0xff]  ;;  %v548_v3 = vld [vmem:[#allocation5 + $0xe8] sm:$0xff]  ;;  %vm1972_vm0 = vmmov 0   ;;  %v697_v34 = vlaneseq  ;;  %p509_p2 = scmp.lt.s32.totalorder %s2055_s23, 1 }
  0x95   : > { %1939 = vsyncadd (%p2372_p7), [#allocation12], 4294967264  ;;  %820 = vmatprep.mubr.f32.mxu0 %v1971_v0  ;;  %1535 = vmatprep.subr.mxu1 %v1971_v0  ;;  %v547_v4 = vld [vmem:[#allocation5 + $0xe0] sm:$0xff]  ;;  %v546_v5 = vld [vmem:[#allocation5 + $0xd8] sm:$0xff]  ;;  %vm827_vm1 = vcmask 64512   ;;  %s1471_s9 = sshll.u32 %s2055_s23, 7 }
  0x96   : > { %756 = vmatprep.subr.mxu0 %v550_v1  ;;  %v545_v6 = vld [vmem:[#allocation5 + $0xd0] sm:$0xff]  ;;  %v544_v7 = vld [vmem:[#allocation5 + $0xc8] sm:$0xff]  ;;  %v543_v8 = vld [vmem:[#allocation5 + $0xc0] sm:$0xff]  ;;  %1537 = vmatprep.mubr.msk.f32.mxu1 %vm1972_vm0, %v1971_v0  ;;  %v2238_v35 = vshrl.u32 %v697_v34, 7  ;;  %s510_s3 = scalar_select %p509_p2, %s2055_s23, 1 }
  0x97   : > { %757 = vmatpush1.msra.mxu0 %v549_v2  ;;  %v542_v9 = vld [vmem:[#allocation5 + $0xb8] sm:$0xff]  ;;  %v541_v10 = vld [vmem:[#allocation5 + $0xb0] sm:$0xff]  ;;  %v540_v11 = vld [vmem:[#allocation5 + $0xa8] sm:$0xff]  ;;  %s1278_s27 = scalar_lea.sflag [#allocation4], %s2202_s8  ;;  %p2373_p8 = scmp.ne.s32.totalorder %s2362_s21, 0 }
  0x98   : > { %758 = vmatprep.subr.mxu0 %v548_v3  ;;  %v539_v12 = vld [vmem:[#allocation5 + $0xa0] sm:$0xff]  ;;  %v538_v13 = vld [vmem:[#allocation5 + $0x98] sm:$0xff]  ;;  %v537_v14 = vld [vmem:[#allocation5 + $0x90] sm:$0xff]  ;;  %v2242_v36 = vsub.s32 0, %v2238_v35  ;;  %v2248_v38 = vsub.s32 1, %v2238_v35  ;;  %s1462_s24 = sshll.u32 %s510_s3, 3 }
  0x99   : > { %759 = vmatpush1.msra.mxu0 %v547_v4  ;;  %v536_v15 = vld [vmem:[#allocation5 + $0x88] sm:$0xff]  ;;  %v535_v16 = vld [vmem:[#allocation5 + $0x80] sm:$0xff]  ;;  %v534_v17 = vld [vmem:[#allocation5 + $0x78] sm:$0xff]  ;;  %s512_s14 = scalar_lea.vmem %s2327_s0, %s1462_s24  ;;  %s516_s30 = scalar_lea.vmem %s2328_s1, %s1462_s24 }
  0x9a   : > { %760 = vmatprep.subr.mxu0 %v546_v5  ;;  %v533_v18 = vld [vmem:[#allocation5 + $0x70] sm:$0xff]  ;;  %v532_v19 = vld [vmem:[#allocation5 + $0x68] sm:$0xff]  ;;  %v531_v20 = vld [vmem:[#allocation5 + $0x60] sm:$0xff]  ;;  %s1289_s24 = scalar_lea.hbm %s2338_s11, %s1471_s9 }
  0x9b   : > { %761 = vmatpush1.msra.mxu0 %v545_v6  ;;  %v530_v21 = vld [vmem:[#allocation5 + $0x58] sm:$0xff]  ;;  %v529_v22 = vld [vmem:[#allocation5 + $0x50] sm:$0xff]  ;;  %v528_v23 = vld [vmem:[#allocation5 + $0x48] sm:$0xff] }
  0x9c   : > { %762 = vmatprep.subr.mxu0 %v544_v7  ;;  %v527_v24 = vld [vmem:[#allocation5 + $0x40] sm:$0xff]  ;;  %v526_v25 = vld [vmem:[#allocation5 + $0x38] sm:$0xff]  ;;  %v525_v26 = vld [vmem:[#allocation5 + $0x30] sm:$0xff] }
  0x9d   : > { %763 = vmatpush1.msra.mxu0 %v543_v8  ;;  %v524_v27 = vld [vmem:[#allocation5 + $0x28] sm:$0xff]  ;;  %v523_v28 = vld [vmem:[#allocation5 + $0x20] sm:$0xff]  ;;  %v522_v29 = vld [vmem:[#allocation5 + $0x18] sm:$0xff] }
  0x9e   : > { %764 = vmatprep.subr.mxu0 %v542_v9  ;;  %v521_v30 = vld [vmem:[#allocation5 + $0x10] sm:$0xff]  ;;  %v520_v31 = vld [vmem:[#allocation5 + $0x8] sm:$0xff]  ;;  %v519_v32 = vld [vmem:[#allocation5] sm:$0xff] }
  0x9f   : > { %765 = vmatpush1.msra.mxu0 %v541_v10  ;;  %v2229_v33 = vld [vmem:[%s2208_s10] sm:$0xff]  ;;  %v596_v50 = vld [vmem:[#allocation7 + $0x168] sm:$0xff]  ;;  %v643_v51 = vld [vmem:[#allocation7 + $0x2e0] sm:$0xff]  ;;  %s508_s10 = scalar_lea.vmem [#allocation14], %s1454_s29 }
  0xa0   : > { %766 = vmatprep.subr.mxu0 %v540_v11  ;;  %v695_v37 = vld [vmem:[%s2331_s4] sm:$0x3]  ;;  %v646_v44 = vld [vmem:[#allocation7 + $0x2f8] sm:$0xff]  ;;  %v595_v53 = vld [vmem:[#allocation7 + $0x160] sm:$0xff]  ;;  %s1291_s3 = sshll.u32 %s508_s10, 4  ;;  %s1292_s3 = int_to_ptr.vmem [resolvable:$true] %s1291_s3 }
  0xa1   : > { %767 = vmatpush1.msra.mxu0 %v539_v12  ;;  %v700_v39 = vrot.slane %v695_v37, %v2242_v36  ;;  %v704_v40 = vrot.slane %v695_v37, %v2248_v38  ;;  %v517_v43 = vld [vmem:[%s512_s14] sm:$0xff]  ;;  %v598_v46 = vld [vmem:[#allocation7 + $0x178] sm:$0xff]  ;;  %v640_v55 = vld [vmem:[#allocation7 + $0x2c8] sm:$0xff]  ;;  %s1882_s15 = scalar_lea.vmem %s1292_s3, 128  ;;  %s1973_s14 = smov [#allocation14]  }
  0xa2   : > { %768 = vmatprep.subr.mxu0 %v538_v13  ;;  %v518_v48 = vld [vmem:[%s516_s30] sm:$0xff]  ;;  %v594_v52 = vld [vmem:[#allocation7 + $0x158] sm:$0xff]  ;;  %v591_v56 = vld [vmem:[#allocation7 + $0x140] sm:$0xff]  ;;  %p1883_p10 = scmp.ne.s32.totalorder %s1292_s3, %s1882_s15  ;;  %s1886_s12 = sshll.u32 %s1973_s14, 4  ;;  %s1887_s12 = int_to_ptr.vmem [resolvable:$false] %s1886_s12 }
  0xa3   : > { %769 = vmatpush1.msra.mxu0 %v537_v14  ;;  %v597_v49 = vld [vmem:[#allocation7 + $0x170] sm:$0xff]  ;;  %v592_v57 = vld [vmem:[#allocation7 + $0x148] sm:$0xff]  ;;  %v590_v58 = vld [vmem:[#allocation7 + $0x138] sm:$0xff]  ;;  %s1888_s23 = scalar_lea.vmem %s1887_s12, 256  ;;  %p1889_p5 = scmp.lt.s32.totalorder %s1292_s3, %s1887_s12 }
  0xa4   : > { %770 = vmatprep.subr.mxu0 %v536_v15  ;;  %v593_v54 = vld [vmem:[#allocation7 + $0x150] sm:$0xff]  ;;  %v588_v60 = vld [vmem:[#allocation7 + $0x128] sm:$0xff]  ;;  %v587_v62 = vld [vmem:[#allocation7 + $0x120] sm:$0xff]  ;;  %p1884_p12 = pnand %p1883_p10, %p2373_p8  ;;  %p1890_p9 = scmp.lt.s32.totalorder %s1888_s23, %s1882_s15 }
  0xa5   : > { %771 = vmatpush1.msra.mxu0 %v535_v16  ;;  %v637_v59 = vld [vmem:[#allocation7 + $0x2b0] sm:$0xff]  ;;  %v634_v63 = vld [vmem:[#allocation7 + $0x298] sm:$0xff]  ;;  %v584_v3 = vld [vmem:[#allocation7 + $0x108] sm:$0xff] }
  0xa6   : > { %772 = vmatprep.subr.mxu0 %v534_v17  ;;  %v589_v61 = vld [vmem:[#allocation7 + $0x130] sm:$0xff]  ;;  %v586_v2 = vld [vmem:[#allocation7 + $0x118] sm:$0xff]  ;;  %v631_v4 = vld [vmem:[#allocation7 + $0x280] sm:$0xff]  ;;  %p1885_p0 = pneg %p1884_p12  ;;  %p1891_p1 = por %p1890_p9, %p1889_p5 }
  0xa7   : > { %773 = vmatpush1.msra.mxu0 %v533_v18  ;;  %v585_v1 = vld [vmem:[#allocation7 + $0x110] sm:$0xff]  ;;  %v582_v5 = vld [vmem:[#allocation7 + $0xf8] sm:$0xff]  ;;  %v583_v6 = vld [vmem:[#allocation7 + $0x100] sm:$0xff] }
  0xa8   : > { %774 = vmatprep.subr.mxu0 %v532_v19  ;;  %v581_v7 = vld [vmem:[#allocation7 + $0xf0] sm:$0xff]  ;;  %v628_v8 = vld [vmem:[#allocation7 + $0x268] sm:$0xff]  ;;  %v579_v9 = vld [vmem:[#allocation7 + $0xe0] sm:$0xff]  ;;  %p1892_p3 = pnand %p1891_p1, %p1885_p0 }
  0xa9   : > { %775 = vmatpush1.msra.mxu0 %v531_v20  ;;  %v580_v10 = vld [vmem:[#allocation7 + $0xe8] sm:$0xff]  ;;  %v578_v11 = vld [vmem:[#allocation7 + $0xd8] sm:$0xff]  ;;  %v625_v12 = vld [vmem:[#allocation7 + $0x250] sm:$0xff] }
  0xaa   : > { %776 = vmatprep.subr.mxu0 %v530_v21  ;;  %v576_v13 = vld [vmem:[#allocation7 + $0xc8] sm:$0xff]  ;;  %v577_v14 = vld [vmem:[#allocation7 + $0xd0] sm:$0xff]  ;;  %v575_v15 = vld [vmem:[#allocation7 + $0xc0] sm:$0xff] }
  0xab   : > { %777 = vmatpush1.msra.mxu0 %v529_v22  ;;  %v622_v16 = vld [vmem:[#allocation7 + $0x238] sm:$0xff]  ;;  %v573_v17 = vld [vmem:[#allocation7 + $0xb0] sm:$0xff]  ;;  %v572_v19 = vld [vmem:[#allocation7 + $0xa8] sm:$0xff] }
  0xac   : > { %778 = vmatprep.subr.mxu0 %v528_v23  ;;  %v574_v18 = vld [vmem:[#allocation7 + $0xb8] sm:$0xff]  ;;  %v619_v20 = vld [vmem:[#allocation7 + $0x220] sm:$0xff]  ;;  %v569_v23 = vld [vmem:[#allocation7 + $0x90] sm:$0xff] }
  0xad   : > { %779 = vmatpush1.msra.mxu0 %v527_v24  ;;  %v570_v21 = vld [vmem:[#allocation7 + $0x98] sm:$0xff]  ;;  %v571_v22 = vld [vmem:[#allocation7 + $0xa0] sm:$0xff]  ;;  %v616_v24 = vld [vmem:[#allocation7 + $0x208] sm:$0xff] }
  0xae   : > { %780 = vmatprep.subr.mxu0 %v526_v25  ;;  %v567_v25 = vld [vmem:[#allocation7 + $0x80] sm:$0xff]  ;;  %v561_v34 = vld [vmem:[#allocation7 + $0x50] sm:$0xff]  ;;  %v562_v37 = vld [vmem:[#allocation7 + $0x58] sm:$0xff] }
  0xaf   : > { %781 = vmatpush1.msra.mxu0 %v525_v26  ;;  %v568_v26 = vld [vmem:[#allocation7 + $0x88] sm:$0xff] }
  0xb0   : > { %782 = vmatprep.subr.mxu0 %v524_v27  ;;  %v566_v27 = vld [vmem:[#allocation7 + $0x78] sm:$0xff] }
  0xb1   : > { %783 = vmatpush1.msra.mxu0 %v523_v28  ;;  %v613_v28 = vld [vmem:[#allocation7 + $0x1f0] sm:$0xff] }
  0xb2   : > { %784 = vmatprep.subr.mxu0 %v522_v29  ;;  %v564_v29 = vld [vmem:[#allocation7 + $0x68] sm:$0xff] }
  0xb3   : > { %785 = vmatpush1.msra.mxu0 %v521_v30  ;;  %v565_v30 = vld [vmem:[#allocation7 + $0x70] sm:$0xff] }
  0xb4   : > { %786 = vmatprep.subr.mxu0 %v520_v31  ;;  %v563_v31 = vld [vmem:[#allocation7 + $0x60] sm:$0xff] }
  0xb5   : > { %787 = vmatpush1.msra.mxu0 %v519_v32  ;;  %v610_v32 = vld [vmem:[#allocation7 + $0x1d8] sm:$0xff] }
  0xb6   : > { %821 = vmatmul.mubr.f32.vlgmr.msra.gmra.mxu0 %v2229_v33  ;;  %1530 = vmatprep.subr.mxu0 %v1971_v0 }
  0xb7   : > { %1532 = vmatprep.mubr.msk.f32.mxu0 %vm1972_vm0, %v1971_v0 }
 0x176   : > { %v822_v41 = vpop.f32.mrf.mxu0 }
 0x177   : > { %v823_v42 = vadd.f32 %v822_v41, %v700_v39  ;;  %v560_v39 = vld [vmem:[#allocation7 + $0x48] sm:$0xff]  ;;  %v558_v41 = vld [vmem:[#allocation7 + $0x38] sm:$0xff] }
 0x178   : > { %v824_v45 = vpop.f32.mrf.mxu0 }
 0x179   : > { %v825_v47 = vadd.f32 %v824_v45, %v704_v40  ;;  %1531 = vmatpush3.msra.mxu0 %v823_v42  ;;  %v607_v40 = vld [vmem:[#allocation7 + $0x1c0] sm:$0xff]  ;;  %v554_v45 = vld [vmem:[#allocation7 + $0x18] sm:$0xff] }
 0x17a   : > { %1533 = vmatmul.mubr.msk.f32.vlgmr.msra.gmra.mxu0 %vm827_vm1, %v517_v43  ;;  %1478 = vmatprep.subr.mxu0 %v646_v44  ;;  %v559_v42 = vld [vmem:[#allocation7 + $0x40] sm:$0xff]  ;;  %v557_v43 = vld [vmem:[#allocation7 + $0x30] sm:$0xff] }
 0x17b   : > { %1536 = vmatpush3.msra.mxu1 %v825_v47  ;;  %1479 = vmatpush3.msra.mxu0 %v598_v46  ;;  %v555_v44 = vld [vmem:[#allocation7 + $0x20] sm:$0xff]  ;;  %v552_v46 = vld [vmem:[#allocation7 + $0x8] sm:$0xff] }
 0x17c   : > { %1538 = vmatmul.mubr.msk.f32.vlgmr.msra.gmra.mxu1 %vm827_vm1, %v518_v48  ;;  %974 = vmatprep.subr.mxu1 %v597_v49  ;;  %v551_v47 = vld [vmem:[#allocation7] sm:$0xff]  ;;  %v645_v48 = vld [vmem:[#allocation7 + $0x2f0] sm:$0xff]  ;;  %v644_v49 = vld [vmem:[#allocation7 + $0x2e8] sm:$0xff] }
 0x17d   : > { %975 = vmatpush1.msra.mxu1 %v596_v50  ;;  %1480 = vmatprep.subr.mxu0 %v643_v51  ;;  %v642_v50 = vld [vmem:[#allocation7 + $0x2d8] sm:$0xff]  ;;  %v641_v51 = vld [vmem:[#allocation7 + $0x2d0] sm:$0xff] }
 0x17e   : > { %976 = vmatprep.subr.mxu1 %v594_v52  ;;  %1481 = vmatpush3.msra.mxu0 %v595_v53  ;;  %v639_v52 = vld [vmem:[#allocation7 + $0x2c0] sm:$0xff]  ;;  %v638_v53 = vld [vmem:[#allocation7 + $0x2b8] sm:$0xff] }
 0x17f   : > { %977 = vmatpush1.msra.mxu1 %v593_v54  ;;  %1482 = vmatprep.subr.mxu0 %v640_v55  ;;  %v636_v54 = vld [vmem:[#allocation7 + $0x2a8] sm:$0xff]  ;;  %v635_v55 = vld [vmem:[#allocation7 + $0x2a0] sm:$0xff] }
 0x180   : > { %978 = vmatprep.subr.mxu1 %v591_v56  ;;  %1483 = vmatpush3.msra.mxu0 %v592_v57  ;;  %v633_v56 = vld [vmem:[#allocation7 + $0x290] sm:$0xff]  ;;  %v632_v57 = vld [vmem:[#allocation7 + $0x288] sm:$0xff] }
 0x181   : > { %979 = vmatpush1.msra.mxu1 %v590_v58  ;;  %1484 = vmatprep.subr.mxu0 %v637_v59  ;;  %v630_v58 = vld [vmem:[#allocation7 + $0x278] sm:$0xff]  ;;  %v629_v59 = vld [vmem:[#allocation7 + $0x270] sm:$0xff] }
 0x182   : > { %980 = vmatprep.subr.mxu1 %v588_v60  ;;  %1485 = vmatpush3.msra.mxu0 %v589_v61  ;;  %v627_v60 = vld [vmem:[#allocation7 + $0x260] sm:$0xff]  ;;  %v626_v61 = vld [vmem:[#allocation7 + $0x258] sm:$0xff] }
 0x183   : > { %981 = vmatpush1.msra.mxu1 %v587_v62  ;;  %1486 = vmatprep.subr.mxu0 %v634_v63  ;;  %v624_v62 = vld [vmem:[#allocation7 + $0x248] sm:$0xff]  ;;  %v623_v63 = vld [vmem:[#allocation7 + $0x240] sm:$0xff] }
 0x184   : > { %982 = vmatprep.subr.mxu1 %v585_v1  ;;  %1487 = vmatpush3.msra.mxu0 %v586_v2  ;;  %v621_v1 = vld [vmem:[#allocation7 + $0x230] sm:$0xff]  ;;  %v620_v2 = vld [vmem:[#allocation7 + $0x228] sm:$0xff] }
 0x185   : > { %983 = vmatpush1.msra.mxu1 %v584_v3  ;;  %1488 = vmatprep.subr.mxu0 %v631_v4  ;;  %v618_v3 = vld [vmem:[#allocation7 + $0x218] sm:$0xff]  ;;  %v617_v4 = vld [vmem:[#allocation7 + $0x210] sm:$0xff] }
 0x186   : > { %984 = vmatprep.subr.mxu1 %v582_v5  ;;  %1489 = vmatpush3.msra.mxu0 %v583_v6  ;;  %v615_v5 = vld [vmem:[#allocation7 + $0x200] sm:$0xff]  ;;  %v614_v6 = vld [vmem:[#allocation7 + $0x1f8] sm:$0xff] }
 0x187   : > { %985 = vmatpush1.msra.mxu1 %v581_v7  ;;  %1490 = vmatprep.subr.mxu0 %v628_v8  ;;  %v612_v7 = vld [vmem:[#allocation7 + $0x1e8] sm:$0xff]  ;;  %v611_v8 = vld [vmem:[#allocation7 + $0x1e0] sm:$0xff] }
 0x188   : > { %986 = vmatprep.subr.mxu1 %v579_v9  ;;  %1491 = vmatpush3.msra.mxu0 %v580_v10  ;;  %v609_v9 = vld [vmem:[#allocation7 + $0x1d0] sm:$0xff]  ;;  %v608_v10 = vld [vmem:[#allocation7 + $0x1c8] sm:$0xff] }
 0x189   : > { %987 = vmatpush1.msra.mxu1 %v578_v11  ;;  %1492 = vmatprep.subr.mxu0 %v625_v12  ;;  %v606_v11 = vld [vmem:[#allocation7 + $0x1b8] sm:$0xff]  ;;  %v605_v12 = vld [vmem:[#allocation7 + $0x1b0] sm:$0xff] }
 0x18a   : > { %988 = vmatprep.subr.mxu1 %v576_v13  ;;  %1493 = vmatpush3.msra.mxu0 %v577_v14  ;;  %v604_v13 = vld [vmem:[#allocation7 + $0x1a8] sm:$0xff]  ;;  %v603_v14 = vld [vmem:[#allocation7 + $0x1a0] sm:$0xff] }
 0x18b   : > { %989 = vmatpush1.msra.mxu1 %v575_v15  ;;  %1494 = vmatprep.subr.mxu0 %v622_v16  ;;  %v556_v15 = vld [vmem:[#allocation7 + $0x28] sm:$0xff]  ;;  %v602_v16 = vld [vmem:[#allocation7 + $0x198] sm:$0xff] }
 0x18c   : > { %990 = vmatprep.subr.mxu1 %v573_v17  ;;  %1495 = vmatpush3.msra.mxu0 %v574_v18  ;;  %v601_v17 = vld [vmem:[#allocation7 + $0x190] sm:$0xff]  ;;  %v600_v18 = vld [vmem:[#allocation7 + $0x188] sm:$0xff] }
 0x18d   : > { %991 = vmatpush1.msra.mxu1 %v572_v19  ;;  %1496 = vmatprep.subr.mxu0 %v619_v20  ;;  %v553_v19 = vld [vmem:[#allocation7 + $0x10] sm:$0xff]  ;;  %v599_v20 = vld [vmem:[#allocation7 + $0x180] sm:$0xff] }
 0x18e   : > { %992 = vmatprep.subr.mxu1 %v570_v21  ;;  %1497 = vmatpush3.msra.mxu0 %v571_v22  ;;  %v693_v21 = vld [vmem:[#allocation8 + $0x170] sm:$0xff]  ;;  %v1464_v22 = vld [vmem:[#allocation11] ss:$0 sm:$0xff] }
 0x18f   : > { %993 = vmatpush1.msra.mxu1 %v569_v23  ;;  %1498 = vmatprep.subr.mxu0 %v616_v24  ;;  %v1465_v24 = vld [vmem:[#allocation13] ss:$0 sm:$0xff] }
 0x190   : > { %994 = vmatprep.subr.mxu1 %v567_v25  ;;  %1499 = vmatpush3.msra.mxu0 %v568_v26 }
 0x191   : > { %995 = vmatpush1.msra.mxu1 %v566_v27  ;;  %1500 = vmatprep.subr.mxu0 %v613_v28 }
 0x192   : > { %996 = vmatprep.subr.mxu1 %v564_v29  ;;  %1501 = vmatpush3.msra.mxu0 %v565_v30  ;;  %v692_v30 = vld [vmem:[#allocation8 + $0x168] sm:$0xff] }
 0x193   : > { %997 = vmatpush1.msra.mxu1 %v563_v31  ;;  %1502 = vmatprep.subr.mxu0 %v610_v32  ;;  %v690_v31 = vld [vmem:[#allocation8 + $0x158] sm:$0xff] }
 0x194   : > { %998 = vmatprep.subr.mxu1 %v561_v34  ;;  %1503 = vmatpush3.msra.mxu0 %v562_v37  ;;  %v694_v32 = vld [vmem:[#allocation8 + $0x178] sm:$0xff]  ;;  %v689_v34 = vld [vmem:[#allocation8 + $0x150] sm:$0xff]  ;;  %v687_v37 = vld [vmem:[#allocation8 + $0x140] sm:$0xff] }
 0x195   : > { %999 = vmatpush1.msra.mxu1 %v560_v39  ;;  %1504 = vmatprep.subr.mxu0 %v607_v40  ;;  %v691_v39 = vld [vmem:[#allocation8 + $0x160] sm:$0xff]  ;;  %v686_v40 = vld [vmem:[#allocation8 + $0x138] sm:$0xff] }
 0x196   : > { %1000 = vmatprep.subr.mxu1 %v558_v41  ;;  %1505 = vmatpush3.msra.mxu0 %v559_v42  ;;  %v684_v41 = vld [vmem:[#allocation8 + $0x128] sm:$0xff] }
 0x197   : > { %1001 = vmatpush1.msra.mxu1 %v557_v43  ;;  %1506 = vmatprep.subr.mxu0 %v604_v13  ;;  %v688_v42 = vld [vmem:[#allocation8 + $0x148] sm:$0xff]  ;;  %v683_v43 = vld [vmem:[#allocation8 + $0x120] sm:$0xff]  ;;  %v650_v13 = vld [vmem:[#allocation8 + $0x18] sm:$0xff] }
 0x198   : > { %1002 = vmatprep.subr.mxu1 %v555_v44  ;;  %1507 = vmatpush3.msra.mxu0 %v556_v15  ;;  %v681_v44 = vld [vmem:[#allocation8 + $0x110] sm:$0xff]  ;;  %v652_v15 = vld [vmem:[#allocation8 + $0x28] sm:$0xff] }
 0x199   : > { %1003 = vmatpush1.msra.mxu1 %v554_v45  ;;  %1508 = vmatprep.subr.mxu0 %v601_v17  ;;  %v685_v45 = vld [vmem:[#allocation8 + $0x130] sm:$0xff] }
 0x19a   : > { %1004 = vmatprep.subr.mxu1 %v552_v46  ;;  %1509 = vmatpush3.msra.mxu0 %v553_v19  ;;  %v680_v46 = vld [vmem:[#allocation8 + $0x108] sm:$0xff]  ;;  %v649_v17 = vld [vmem:[#allocation8 + $0x10] sm:$0xff] }
 0x19b   : > { %1005 = vmatpush1.msra.mxu1 %v551_v47  ;;  %1115 = vmatprep.subr.mxu0 %v693_v21  ;;  %v678_v47 = vld [vmem:[#allocation8 + $0xf8] sm:$0xff] }
 0x19c   : > { %1006 = vmatprep.subr.mxu1 %v645_v48  ;;  %v682_v48 = vld [vmem:[#allocation8 + $0x118] sm:$0xff] }
 0x19d   : > { %1007 = vmatpush2.msra.mxu1 %v644_v49  ;;  %v677_v49 = vld [vmem:[#allocation8 + $0xf0] sm:$0xff] }
 0x19e   : > { %1008 = vmatprep.subr.mxu1 %v642_v50  ;;  %v675_v50 = vld [vmem:[#allocation8 + $0xe0] sm:$0xff] }
 0x19f   : > { %1009 = vmatpush2.msra.mxu1 %v641_v51  ;;  %v679_v51 = vld [vmem:[#allocation8 + $0x100] sm:$0xff] }
 0x1a0   : > { %1010 = vmatprep.subr.mxu1 %v639_v52  ;;  %v674_v52 = vld [vmem:[#allocation8 + $0xd8] sm:$0xff] }
 0x1a1   : > { %1011 = vmatpush2.msra.mxu1 %v638_v53  ;;  %v672_v53 = vld [vmem:[#allocation8 + $0xc8] sm:$0xff] }
 0x1a2   : > { %1012 = vmatprep.subr.mxu1 %v636_v54  ;;  %v676_v54 = vld [vmem:[#allocation8 + $0xe8] sm:$0xff] }
 0x1a3   : > { %1013 = vmatpush2.msra.mxu1 %v635_v55  ;;  %v671_v55 = vld [vmem:[#allocation8 + $0xc0] sm:$0xff] }
 0x1a4   : > { %1014 = vmatprep.subr.mxu1 %v633_v56  ;;  %v669_v56 = vld [vmem:[#allocation8 + $0xb0] sm:$0xff] }
 0x1a5   : > { %1015 = vmatpush2.msra.mxu1 %v632_v57  ;;  %v673_v57 = vld [vmem:[#allocation8 + $0xd0] sm:$0xff] }
 0x1a6   : > { %1016 = vmatprep.subr.mxu1 %v630_v58  ;;  %v668_v58 = vld [vmem:[#allocation8 + $0xa8] sm:$0xff] }
 0x1a7   : > { %1017 = vmatpush2.msra.mxu1 %v629_v59  ;;  %v666_v59 = vld [vmem:[#allocation8 + $0x98] sm:$0xff] }
 0x1a8   : > { %1018 = vmatprep.subr.mxu1 %v627_v60  ;;  %v670_v60 = vld [vmem:[#allocation8 + $0xb8] sm:$0xff] }
 0x1a9   : > { %1019 = vmatpush2.msra.mxu1 %v626_v61  ;;  %v665_v61 = vld [vmem:[#allocation8 + $0x90] sm:$0xff] }
 0x1aa   : > { %1020 = vmatprep.subr.mxu1 %v624_v62  ;;  %v663_v62 = vld [vmem:[#allocation8 + $0x80] sm:$0xff] }
 0x1ab   : > { %1021 = vmatpush2.msra.mxu1 %v623_v63  ;;  %v667_v63 = vld [vmem:[#allocation8 + $0xa0] sm:$0xff] }
 0x1ac   : > { %1022 = vmatprep.subr.mxu1 %v621_v1  ;;  %v662_v1 = vld [vmem:[#allocation8 + $0x78] sm:$0xff] }
 0x1ad   : > { %1023 = vmatpush2.msra.mxu1 %v620_v2  ;;  %v660_v2 = vld [vmem:[#allocation8 + $0x68] sm:$0xff] }
 0x1ae   : > { %1024 = vmatprep.subr.mxu1 %v618_v3  ;;  %v664_v3 = vld [vmem:[#allocation8 + $0x88] sm:$0xff] }
 0x1af   : > { %1025 = vmatpush2.msra.mxu1 %v617_v4  ;;  %v659_v4 = vld [vmem:[#allocation8 + $0x60] sm:$0xff] }
 0x1b0   : > { %1026 = vmatprep.subr.mxu1 %v615_v5  ;;  %v657_v5 = vld [vmem:[#allocation8 + $0x50] sm:$0xff] }
 0x1b1   : > { %1027 = vmatpush2.msra.mxu1 %v614_v6  ;;  %v661_v6 = vld [vmem:[#allocation8 + $0x70] sm:$0xff] }
 0x1b2   : > { %1028 = vmatprep.subr.mxu1 %v612_v7  ;;  %v656_v7 = vld [vmem:[#allocation8 + $0x48] sm:$0xff] }
 0x1b3   : > { %1029 = vmatpush2.msra.mxu1 %v611_v8  ;;  %v654_v8 = vld [vmem:[#allocation8 + $0x38] sm:$0xff] }
 0x1b4   : > { %1030 = vmatprep.subr.mxu1 %v609_v9  ;;  %v658_v9 = vld [vmem:[#allocation8 + $0x58] sm:$0xff] }
 0x1b5   : > { %1031 = vmatpush2.msra.mxu1 %v608_v10  ;;  %v653_v10 = vld [vmem:[#allocation8 + $0x30] sm:$0xff] }
 0x1b6   : > { %1032 = vmatprep.subr.mxu1 %v606_v11  ;;  %v651_v11 = vld [vmem:[#allocation8 + $0x20] sm:$0xff] }
 0x1b7   : > { %1033 = vmatpush2.msra.mxu1 %v605_v12  ;;  %v655_v12 = vld [vmem:[#allocation8 + $0x40] sm:$0xff] }
 0x1b8   : > { %1034 = vmatprep.subr.mxu1 %v603_v14  ;;  %v648_v14 = vld [vmem:[#allocation8 + $0x8] sm:$0xff] }
 0x1b9   : > { %1035 = vmatpush2.msra.mxu1 %v602_v16  ;;  %v647_v16 = vld [vmem:[#allocation8] sm:$0xff] }
 0x1ba   : > { %1036 = vmatprep.subr.mxu1 %v600_v18  ;;  %v707_v18 = vld [vmem:[%s2333_s6] sm:$0x7] }
 0x1bb   : > { %1037 = vmatpush2.msra.mxu1 %v599_v20  ;;  %v724_v20 = vld [vmem:[#allocation10] sm:$0x7] }
 0x1bc   : > { %1540 = vmatprep.subr.mxu1 %v1971_v0 }
 0x23a   : > { %v897_v23 = vpop.f32.mrf.mxu0 }
 0x23b   : > { %v898_v25 = vadd.f32 %v1464_v22, %v897_v23  ;;  %v712_v22 = vrot.slane %v707_v18, %v2242_v36  ;;  %v729_v23 = vrot.slane %v724_v20, %v2242_v36 }
 0x23c   : > { %v970_v26 = vpop.f32.mrf.mxu1  ;;  %v1534_v27 = vpop.f32.mrf.mxu0 }
 0x23d   : > { %v971_v28 = vadd.f32 %v1465_v24, %v970_v26 }
 0x23e   : > { %v1539_v29 = vpop.f32.mrf.mxu1 }
 0x23f   : > { %1038 = vmatprep.mubr.f32.mxu1 %v971_v28  ;;  %1109 = vmatprep.mubr.f32.mxu0 %v971_v28 }
 0x240   : > { %1039 = vmatmul.mubr.f32.vlgmr.msra.gmra.mxu1 %v898_v25  ;;  %1110 = vmatmul.mubr.f32.vlgmr.msra.gmra.mxu0 %v898_v25 }
 0x241   : > { %1116 = vmatpush1.msra.mxu0 %v692_v30  ;;  %1179 = vmatprep.mubr.f32.mxu0 %v1971_v0 }
 0x242   : > { %1117 = vmatprep.subr.mxu0 %v690_v31  ;;  %1541 = vmatpush3.msra.mxu1 %v694_v32  ;;  %v733_v32 = vrot.slane %v724_v20, %v2248_v38 }
 0x243   : > { %1118 = vmatpush1.msra.mxu0 %v689_v34  ;;  %1542 = vmatprep.subr.mxu1 %v1971_v0 }
 0x244   : > { %1119 = vmatprep.subr.mxu0 %v687_v37  ;;  %1543 = vmatpush3.msra.mxu1 %v691_v39  ;;  %v716_v37 = vrot.slane %v707_v18, %v2248_v38 }
 0x245   : > { %1120 = vmatpush1.msra.mxu0 %v686_v40  ;;  %1544 = vmatprep.subr.mxu1 %v1971_v0 }
 0x246   : > { %1121 = vmatprep.subr.mxu0 %v684_v41  ;;  %1545 = vmatpush3.msra.mxu1 %v688_v42 }
 0x247   : > { %1122 = vmatpush1.msra.mxu0 %v683_v43  ;;  %1546 = vmatprep.subr.mxu1 %v1971_v0 }
 0x248   : > { %1123 = vmatprep.subr.mxu0 %v681_v44  ;;  %1547 = vmatpush3.msra.mxu1 %v685_v45  ;;  %v719_v44 = vsub.s32 2, %v2238_v35 }
 0x249   : > { %1124 = vmatpush1.msra.mxu0 %v680_v46  ;;  %1548 = vmatprep.subr.mxu1 %v1971_v0 }
 0x24a   : > { %1125 = vmatprep.subr.mxu0 %v678_v47  ;;  %1549 = vmatpush3.msra.mxu1 %v682_v48  ;;  %v737_v45 = vrot.slane %v724_v20, %v719_v44  ;;  %v720_v46 = vrot.slane %v707_v18, %v719_v44 }
 0x24b   : > { %1126 = vmatpush1.msra.mxu0 %v677_v49  ;;  %1550 = vmatprep.subr.mxu1 %v1971_v0 }
 0x24c   : > { %1127 = vmatprep.subr.mxu0 %v675_v50  ;;  %1551 = vmatpush3.msra.mxu1 %v679_v51 }
 0x24d   : > { %1128 = vmatpush1.msra.mxu0 %v674_v52  ;;  %1552 = vmatprep.subr.mxu1 %v1971_v0 }
 0x24e   : > { %1129 = vmatprep.subr.mxu0 %v672_v53  ;;  %1553 = vmatpush3.msra.mxu1 %v676_v54 }
 0x24f   : > { %1130 = vmatpush1.msra.mxu0 %v671_v55  ;;  %1554 = vmatprep.subr.mxu1 %v1971_v0 }
 0x250   : > { %1131 = vmatprep.subr.mxu0 %v669_v56  ;;  %1555 = vmatpush3.msra.mxu1 %v673_v57 }
 0x251   : > { %1132 = vmatpush1.msra.mxu0 %v668_v58  ;;  %1556 = vmatprep.subr.mxu1 %v1971_v0 }
 0x252   : > { %1133 = vmatprep.subr.mxu0 %v666_v59  ;;  %1557 = vmatpush3.msra.mxu1 %v670_v60 }
 0x253   : > { %1134 = vmatpush1.msra.mxu0 %v665_v61  ;;  %1558 = vmatprep.subr.mxu1 %v1971_v0 }
 0x254   : > { %1135 = vmatprep.subr.mxu0 %v663_v62  ;;  %1559 = vmatpush3.msra.mxu1 %v667_v63 }
 0x255   : > { %1136 = vmatpush1.msra.mxu0 %v662_v1  ;;  %1560 = vmatprep.subr.mxu1 %v1971_v0 }
 0x256   : > { %1137 = vmatprep.subr.mxu0 %v660_v2  ;;  %1561 = vmatpush3.msra.mxu1 %v664_v3 }
 0x257   : > { %1138 = vmatpush1.msra.mxu0 %v659_v4  ;;  %1562 = vmatprep.subr.mxu1 %v1971_v0 }
 0x258   : > { %1139 = vmatprep.subr.mxu0 %v657_v5  ;;  %1563 = vmatpush3.msra.mxu1 %v661_v6 }
 0x259   : > { %1140 = vmatpush1.msra.mxu0 %v656_v7  ;;  %1564 = vmatprep.subr.mxu1 %v1971_v0 }
 0x25a   : > { %1141 = vmatprep.subr.mxu0 %v654_v8  ;;  %1565 = vmatpush3.msra.mxu1 %v658_v9 }
 0x25b   : > { %1142 = vmatpush1.msra.mxu0 %v653_v10  ;;  %1566 = vmatprep.subr.mxu1 %v1971_v0 }
 0x25c   : > { %1143 = vmatprep.subr.mxu0 %v651_v11  ;;  %1567 = vmatpush3.msra.mxu1 %v655_v12 }
 0x25d   : > { %1144 = vmatpush1.msra.mxu0 %v650_v13  ;;  %1568 = vmatprep.subr.mxu1 %v1971_v0 }
 0x25e   : > { %1145 = vmatprep.subr.mxu0 %v648_v14  ;;  %1569 = vmatpush3.msra.mxu1 %v652_v15 }
 0x25f   : > { %1146 = vmatpush1.msra.mxu0 %v647_v16  ;;  %1570 = vmatprep.subr.mxu1 %v1971_v0 }
 0x260   : > { %1180 = vmatmul.mubr.f32.vlgmr.msra.gmra.mxu0 %v2229_v33  ;;  %1571 = vmatpush3.msra.mxu1 %v649_v17 }
 0x261   : > { %1572 = vmatprep.mubr.msk.f32.mxu1 %vm1972_vm0, %v1971_v0 }
 0x262   : > { %1573 = vmatmul.mubr.f32.vlgmr.msra.gmra.mxu1 %v2229_v33 }
 0x300   : > { %v1510_v19 = vpop.f32.mrf.mxu0  ;;  %v1040_v21 = vpop.f32.mrf.mxu1 }
 0x301   : > { %v1041_v27 = vadd.f32 %v1040_v21, %v712_v22 }
 0x302   : > { %v1511_v24 = vpop.f32.mrf.mxu0  ;;  %v1042_v25 = vpop.f32.mrf.mxu1 }
 0x303   : > { %v1043_v40 = vadd.f32 %v1042_v25, %v716_v37  ;;  %v1512_v47 = vadd.f32 %v1511_v24, %v1510_v19 }
 0x305   : > { %v1112_v51 = vadd.f32 %v1512_v47, %v720_v46 }
 0x320   : > { %v1181_v26 = vpop.f32.mrf.mxu0 }
 0x321   : > { %v1182_v28 = vadd.f32 %v1181_v26, %v729_v23 }
 0x322   : > { %v1252_v29 = vpop.f32.mrf.mxu1  ;;  %v1183_v34 = vpop.f32.mrf.mxu0 }
 0x323   : > { %v1256_v0 = vadd.f32 %v1182_v28, %v1041_v27  ;;  %v1184_v39 = vadd.f32 %v1183_v34, %v733_v32  ;;  %v1253_v48 = vadd.f32 %v1252_v29, %v737_v45 }
 0x324   : > { %v1574_v30 = vpop.f32.mrf.mxu1 }
 0x325   : > { %v1468_v31 = vmul.f32 -1.442695, %v1256_v0  ;;  %v1263_v41 = vadd.f32 %v1184_v39, %v1043_v40 }
 0x327   : > { %1688 = vpow2.f32 %v1468_v31  ;;  %v1469_v42 = vmul.f32 -1.442695, %v1263_v41 }
 0x329   : > { %1690 = vpow2.f32 %v1469_v42 }
 0x334   : > { %v1689_v36 = vpop.eup %1688 }
 0x335   : > { %v1260_v43 = vadd.f32 1.0, %v1689_v36 }
 0x336   : > { %v1691_v49 = vpop.eup %1690 }
 0x337   : > { %1692 = vrcp.f32 %v1260_v43  ;;  %v1267_v52 = vadd.f32 1.0, %v1691_v49 }
 0x344   : > { %v1693_v50 = vpop.eup %1692 }
 0x345   : > { %v1270_v38 = vmul.f32 %v1693_v50, %v1253_v48 }
 0x347   : > { %v1271_v53 = vadd.f32 %v1270_v38, %v1112_v51 }
 0x349   : > { %1694 = vtanh.f32 %v1271_v53 }
 0x34a   : > { %1696 = vrcp.f32 %v1267_v52 }
 0x356   : > { %v1695_v54 = vpop.eup %1694 }
 0x357   : > { %v1273_v55 = vsub.f32 %v2229_v33, %v1695_v54  ;;  %v1697_v35 = vpop.eup %1696 }
 0x359   : > { %v1274_v56 = vmul.f32 %v1697_v35, %v1273_v55 }
 0x35b   : > { %v1275_v57 = vadd.f32 %v1695_v54, %v1274_v56 }
 0x35d   : > { %1276 = vst [vmem:[%s508_s10] sm:$0xff] %v1275_v57 }
 0x35e   : > { %1895 = shalt.err (!%p1892_p3)
}
 0x35f   : > { %s1896_s29 = scalar_lea.hbm %s1289_s24, 128  ;;  %s1900_s30 = scalar_lea.hbm %s2338_s11, 256 }
 0x360   : > { %p1897_p4 = scmp.ne.s32.totalorder %s1289_s24, %s1896_s29  ;;  %p1901_p13 = scmp.lt.s32.totalorder %s1289_s24, %s2338_s11 }
 0x361   : > { %p1902_p7 = scmp.lt.s32.totalorder %s1900_s30, %s1896_s29 }
 0x362   : > { %p1898_p6 = pnand %p1897_p4, %p2373_p8 }
 0x363   : > { %p1903_p2 = por %p1902_p7, %p1901_p13 }
 0x364   : > { %p1899_p11 = pneg %p1898_p6 }
 0x366   : > { %p1904_p10 = pnand %p1903_p2, %p1899_p11 }
 0x368   : > { %1907 = shalt.err (!%p1904_p10)
}
 0x369   : > { %1601 = dma.vmem_to_hbm [thread:$0]  (%p2373_p8), %s1292_s3, 128, %s1289_s24, %s1278_s27  }
 0x36a PF: > { %s1303_s9 = sand.u32 1, %s1946_s17   ;;  %p2374_p12 = scmp.ne.s32.totalorder %s2363_s22, 0 }
 0x36b   : > { %p2375_p0 = scmp.ge.s32.totalorder %s1958_s20, 2  ;;  %s1304_s10 = scalar_lea.sflag [#allocation4], %s1303_s9 }
 0x36d   : > { %p1627_p5 = pnand %p2375_p0, %p2374_p12 }
 0x36f   : > { %p1628_p9 = pneg %p1627_p5 }
 0x371   : > { %1941 = dma.done.wait (%p1628_p9), %s1304_s10, 128  }
 0x372   : > { %1943 = vsyncadd (%p1628_p9), %s1304_s10, 4294967168  ;;  %p27_p1 = scmp.ge.s32.totalorder %s2139_s25, 4   ;;  %s2376_s17 = smov %s1950_s18 }
 0x373   : > { %s2377_s18 = smov %s1954_s19  ;;  %s2378_s19 = smov %s2150_s26 }
 0x374   : > { %s2379_s20 = smov %s2139_s25  ;;  %29 = sbr.rel (!%p27_p1) target bundleno = 15 (0xf), region = 139 }
 0x379   :  { %1309 = vsyncpa [#allocation3], 1 }
 0x37a   :  { %1311 = vsyncpa [#allocation3 + $0x1], 1 }
 0x37b   :  { %1312 = vsyncpa [#allocation6], 1 }
 0x37c   :  { %1313 = vsyncpa [#allocation9], 1 }
 0x37d   :  { %1314 = vsyncpa [#allocation12], 1 }
 0x37e   :  { %1315 = vsyncpa [#allocation4], 1 }
 0x37f   :  { %1317 = vsyncpa [#allocation4 + $0x1], 1 }

// kernel: tpu_custom_call.1
= control target key start
LH: loop header
LB: loop body
LE: loop exit
PB: predicated region body
PF: predicated region fallthrough
CT: control target
= control target key end

     0   :  { %s2327_s0 = inlined_call_operand.vmem [shape: f32[2,8,8], index: 0, kind: input, shape index: {}]   ;;  %s2328_s1 = inlined_call_operand.vmem [shape: f32[2,8,8], index: 1, kind: input, shape index: {}]   ;;  %s2329_s2 = inlined_call_operand.hbm [shape: f32[2,8,128], index: 2, kind: input, shape index: {}, may-alias: {2,11}]   ;;  %s2330_s3 = inlined_call_operand.hbm [shape: f32[128,256], index: 3, kind: input, shape index: {}]   ;;  %s2331_s4 = inlined_call_operand.vmem [shape: f32[1,256], index: 4, kind: input, shape index: {}]   ;;  %s2332_s5 = inlined_call_operand.hbm [shape: f32[256,384], index: 5, kind: input, shape index: {}]   ;;  %s2333_s6 = inlined_call_operand.vmem [shape: f32[1,384], index: 6, kind: input, shape index: {}]   ;;  %s2334_s7 = inlined_call_operand.hbm [shape: f32[128,384], index: 7, kind: input, shape index: {}]   ;;  %s2335_s8 = inlined_call_operand.hbm [shape: f32[1,384], index: 8, kind: input, shape index: {}]   ;;  %s2336_s9 = inlined_call_operand.hbm [shape: f32[1,128], index: 9, kind: input, shape index: {}]   ;;  %s2337_s10 = inlined_call_operand.hbm [shape: f32[1,128], index: 10, kind: input, shape index: {}]   ;;  %s2338_s11 = inlined_call_operand.hbm [shape: f32[2,8,128], index: 11, kind: output, shape index: {}, may-alias: {2,11}]  }
   0x1   :  { %2344 = sst [smem:[#allocation20_spill]] %s2330_s3 }
   0x2   :  { %2345 = sst [smem:[#allocation21_spill]] %s2332_s5 }
   0x3   :  { %2346 = sst [smem:[#allocation22_spill]] %s2334_s7 }
   0x4   :  { %2347 = sst [smem:[#allocation23_spill]] %s2335_s8 }
   0x5   :  { %2348 = sst [smem:[#allocation24_spill]] %s2336_s9 }
   0x6   :  { %2349 = sst [smem:[#allocation25_spill]] %s2337_s10 }
   0x7   :  { %16 = vsyncpa [#allocation3], 0 }
   0x8   :  { %18 = vsyncpa [#allocation3 + $0x1], 0 }
   0x9   :  { %19 = vsyncpa [#allocation6], 0 }
   0xa   :  { %20 = vsyncpa [#allocation9], 0 }
   0xb   :  { %21 = vsyncpa [#allocation12], 0 }
   0xc   :  { %22 = vsyncpa [#allocation4], 0 }
   0xd   :  { %24 = vsyncpa [#allocation4 + $0x1], 0  ;;  %s2034_s17 = smov 0   ;;  %s2036_s18 = smov 0  }
   0xe   :  { %s2038_s19 = smov 0   ;;  %s2040_s20 = smov 0  }
   0xf LB: > { %s1960_s21 = smov [#allocation5]   ;;  %s2055_s23 = sadd.s32 4294967295, %s1958_s20   ;;  %s1958_s20 = sphi %s2040_s20, %s2379_s20   ;;  %s1954_s19 = sphi %s2038_s19, %s2378_s19   ;;  %s1950_s18 = sphi %s2036_s18, %s2377_s18   ;;  %s1946_s17 = sphi %s2034_s17, %s2376_s17  }
  0x10   : > { %s319_s22 = sshll.u32 %s1960_s21, 4  ;;  %p1443_p0 = scmp.ge.s32.totalorder %s1958_s20, 1  ;;  %s320_s22 = int_to_ptr.vmem [resolvable:$true] %s319_s22 }
  0x11   : > { %p2340_p1 = scmp.eq.s32.totalorder %s2055_s23, 0  ;;  %p307_p2 = scmp.lt.s32.totalorder %s1958_s20, 3 }
  0x12   : > { %s1961_s26 = smov [#allocation8]   ;;  %s1962_s28 = smov [#allocation11]  }
  0x13   : > { %p2060_p3 = pnand %p1443_p0, %p307_p2  ;;  %s351_s27 = sshll.u32 %s1961_s26, 4  ;;  %s2073_s27 = int_to_ptr.vmem [resolvable:$true] %s351_s27 }
  0x14   : > { %s2075_s29 = sshll.u32 %s1962_s28, 4  ;;  %s1709_s12 = scalar_lea.vmem %s320_s22, 4096  ;;  %s377_s29 = int_to_ptr.vmem [resolvable:$true] %s2075_s29 }
  0x15   : > { %s2350_s24 = scalar_select %p2060_p3, 1, 0 }
  0x16   : > { %p1603_p5 = pneg %p2060_p3  ;;  %p1710_p8 = scmp.ne.s32.totalorder %s320_s22, %s1709_s12 }
  0x17   : > { %p1717_p11 = scmp.lt.s32.totalorder %s320_s22, %s320_s22  ;;  %p1718_p12 = scmp.lt.s32.totalorder %s1709_s12, %s1709_s12 }
  0x18   : > { %p2069_p6 = pnand %p1603_p5, %p2340_p1 }
  0x19   : > { %p1719_p13 = por %p1718_p12, %p1717_p11 }
  0x1a   : > { %p2079_p7 = pneg %p2069_p6 }
  0x1c   : > { %p1712_p9 = pnand %p1710_p8, %p2079_p7 }
  0x1e   : > { %p1713_p10 = pneg %p1712_p9 }
  0x20   : > { %p1720_p0 = pnand %p1719_p13, %p1713_p10 }
  0x22   : > { %1723 = shalt.err (!%p1720_p0)
}
  0x23   : > { %s1963_s13 = smov 256   ;;  %s1964_s14 = smov 16  }
  0x24   : > { %s2353_s3 = sld [smem:[#allocation20_spill]]  ;;  %s1735_s21 = scalar_lea.vmem %s2073_s27, 6144 }
  0x25   : > { %p1736_p2 = scmp.ne.s32.totalorder %s2073_s27, %s1735_s21  ;;  %p1743_p9 = scmp.lt.s32.totalorder %s2073_s27, %s2073_s27 }
  0x26   : > { %p1744_p10 = scmp.lt.s32.totalorder %s1735_s21, %s1735_s21 }
  0x27   : > { %p1738_p5 = pnand %p1736_p2, %p2079_p7 }
  0x28   : > { %p1745_p11 = por %p1744_p10, %p1743_p9 }
  0x29   : > { %p1739_p8 = pneg %p1738_p5 }
  0x2a   : > { %1606 = dma.hbm_to_vmem [thread:$0]  (!%p2069_p6), %s2353_s3, 4096, %s320_s22, [#allocation6], %s1963_s13, %s1963_s13, %s1964_s14  }
  0x2b   : > { %p1746_p12 = pnand %p1745_p11, %p1739_p8 }
  0x2d   : > { %1749 = shalt.err (!%p1746_p12)
}
  0x2e   : > { %s2339_s26 = smov 384   ;;  %s1966_s28 = smov 24  }
  0x2f   : > { %s2354_s7 = sld [smem:[#allocation22_spill]]  ;;  %s1761_s13 = scalar_lea.vmem %s377_s29, 16 }
  0x30   : > { %p1762_p13 = scmp.ne.s32.totalorder %s377_s29, %s1761_s13  ;;  %s1768_s14 = scalar_lea.vmem %s377_s29, 32 }
  0x31   : > { %p1769_p5 = scmp.lt.s32.totalorder %s377_s29, %s377_s29  ;;  %p1770_p8 = scmp.lt.s32.totalorder %s1768_s14, %s1761_s13 }
  0x32   : > { %p1764_p0 = pnand %p1762_p13, %p2079_p7 }
  0x33   : > { %p1771_p9 = por %p1770_p8, %p1769_p5 }
  0x34   : > { %p1765_p2 = pneg %p1764_p0 }
  0x35   : > { %1612 = dma.hbm_to_vmem [thread:$0]  (!%p2069_p6), %s2354_s7, 6144, %s2073_s27, [#allocation9], %s2339_s26, %s2339_s26, %s1966_s28  }
  0x36   : > { %p1772_p10 = pnand %p1771_p9, %p1765_p2 }
  0x38   : > { %1775 = shalt.err (!%p1772_p10)
}
  0x39   : > { %s2355_s9 = sld [smem:[#allocation24_spill]]  ;;  %s1967_s27 = smov [#allocation7]  }
  0x3a   : > { %s335_s21 = sshll.u32 %s1967_s27, 4  ;;  %s1968_s22 = smov [#allocation10]   ;;  %s336_s21 = int_to_ptr.vmem [resolvable:$true] %s335_s21 }
  0x3b   : > { %s365_s12 = sshll.u32 %s1968_s22, 4  ;;  %s1787_s26 = scalar_lea.vmem %s336_s21, 12288  ;;  %s366_s12 = int_to_ptr.vmem [resolvable:$true] %s365_s12 }
  0x3c   : > { %p1788_p11 = scmp.ne.s32.totalorder %s336_s21, %s1787_s26  ;;  %p1795_p0 = scmp.lt.s32.totalorder %s336_s21, %s336_s21 }
  0x3d   : > { %p1796_p2 = scmp.lt.s32.totalorder %s1787_s26, %s1787_s26 }
  0x3e   : > { %p1790_p12 = pnand %p1788_p11, %p2079_p7 }
  0x3f   : > { %1618 = dma.hbm_to_vmem [thread:$0]  (!%p2069_p6), %s2355_s9, 16, %s377_s29, [#allocation12]  }
  0x40   : > { %p1791_p13 = pneg %p1790_p12  ;;  %p1797_p5 = por %p1796_p2, %p1795_p0 }
  0x42   : > { %p1798_p8 = pnand %p1797_p5, %p1791_p13 }
  0x44   : > { %1801 = shalt.err (!%p1798_p8)
}
  0x45   : > { %s2356_s13 = smov 384   ;;  %s2357_s5 = sld [smem:[#allocation21_spill]] }
  0x46   : > { %s1813_s15 = scalar_lea.vmem %s366_s12, 48  ;;  %s1820_s26 = scalar_lea.vmem %s366_s12, 64 }
  0x47   : > { %p1814_p9 = scmp.ne.s32.totalorder %s366_s12, %s1813_s15  ;;  %p1821_p12 = scmp.lt.s32.totalorder %s366_s12, %s366_s12 }
  0x48   : > { %p1822_p13 = scmp.lt.s32.totalorder %s1820_s26, %s1813_s15 }
  0x49   : > { %p1816_p10 = pnand %p1814_p9, %p2079_p7 }
  0x4a   : > { %p1823_p0 = por %p1822_p13, %p1821_p12 }
  0x4b   : > { %1609 = dma.hbm_to_vmem [thread:$0]  (!%p2069_p6), %s2357_s5, 12288, %s336_s21, [#allocation6], %s2356_s13, %s2356_s13, %s1966_s28  }
  0x4c   : > { %p1817_p11 = pneg %p1816_p10 }
  0x4e   : > { %p1824_p2 = pnand %p1823_p0, %p1817_p11 }
  0x50   : > { %1827 = shalt.err (!%p1824_p2)
}
  0x51   : > { %s2358_s8 = sld [smem:[#allocation23_spill]]  ;;  %s1969_s28 = smov [#allocation13]  }
  0x52   : > { %s387_s21 = sshll.u32 %s1969_s28, 4  ;;  %s388_s21 = int_to_ptr.vmem [resolvable:$true] %s387_s21 }
  0x53   : > { %s1839_s22 = scalar_lea.vmem %s388_s21, 16  ;;  %s1846_s13 = scalar_lea.vmem %s388_s21, 32 }
  0x54   : > { %p1840_p5 = scmp.ne.s32.totalorder %s388_s21, %s1839_s22  ;;  %p1847_p10 = scmp.lt.s32.totalorder %s388_s21, %s388_s21 }
  0x55   : > { %p1848_p12 = scmp.lt.s32.totalorder %s1846_s13, %s1839_s22 }
  0x56   : > { %p1842_p8 = pnand %p1840_p5, %p2079_p7 }
  0x57   : > { %1615 = dma.hbm_to_vmem [thread:$0]  (!%p2069_p6), %s2358_s8, 48, %s366_s12, [#allocation9]  }
  0x58   : > { %p1843_p9 = pneg %p1842_p8  ;;  %p1849_p11 = por %p1848_p12, %p1847_p10 }
  0x5a   : > { %p1850_p13 = pnand %p1849_p11, %p1843_p9 }
  0x5c   : > { %1853 = shalt.err (!%p1850_p13)
}
  0x5d   : > { %s2359_s10 = sld [smem:[#allocation25_spill]]  ;;  %s1442_s30 = sadd.s32 4294967294, %s1958_s20  }
  0x5e   : > { %s2139_s25 = sadd.s32 1, %s1958_s20   ;;  %s89_s15 = sadd.s32 1, %s1954_s19 }
  0x5f   : > { %s86_s12 = ssub.s32 %s1958_s20, %s2139_s25  ;;  %p96_p0 = scmp.ne.s32.totalorder %s1954_s19, %s1950_s18 }
  0x60   : > { %p87_p7 = scmp.eq.s32.totalorder %s86_s12, 0  ;;  %p97_p2 = scmp.eq.s32.totalorder %s1958_s20, 0 }
  0x61   : > { %p102_p5 = scmp.ne.s32.totalorder %s1950_s18, %s1946_s17  ;;  %p294_p9 = scmp.eq.s32.totalorder %s2055_s23, 1 }
  0x62   : > { %s2150_s26 = scalar_select %p87_p7, %s1954_s19, %s89_s15  }
  0x63   : > { %1621 = dma.hbm_to_vmem [thread:$0]  (!%p2069_p6), %s2359_s10, 16, %s388_s21, [#allocation12]  }
  0x64   : > { %p2152_p8 = por %p97_p2, %p96_p0  ;;  %p2158_p6 = por %p2340_p1, %p102_p5 }
  0x65   : > { %p300_p10 = scmp.eq.s32.totalorder %s1442_s30, 1  ;;  %p1636_p12 = scmp.lt.s32.totalorder %s1958_s20, 2 }
  0x66   : > { %s2361_s27 = scalar_select %p2158_p6, 1, 0 }
  0x67   : > { %s412_s28 = sand.u32 1, %s1954_s19   ;;  %p2165_p11 = por %p294_p9, %p96_p0 }
  0x68   : > { %p2169_p13 = por %p300_p10, %p102_p5  ;;  %s1451_s13 = sshll.u32 %s412_s28, 3 }
  0x69   : > { %s2362_s21 = scalar_select %p2165_p11, 1, 0 }
  0x6a   : > { %s2363_s22 = scalar_select %p2169_p13, 1, 0 }
  0x6b   : > { %s1452_s29 = sshll.u32 %s1958_s20, 7  ;;  %s416_s30 = scalar_lea.vmem [#allocation2], %s1451_s13 }
  0x6c   : > { %s2177_s15 = scalar_lea.hbm %s2329_s2, %s1452_s29  ;;  %s423_s3 = sshll.u32 %s416_s30, 4  ;;  %s424_s3 = int_to_ptr.vmem [resolvable:$true] %s423_s3 }
  0x6d   : > { %p2181_p7 = pnand %p1636_p12, %p2152_p8  ;;  %s413_s7 = scalar_lea.sflag [#allocation3], %s412_s28 }
  0x6e   : > { %s1854_s8 = scalar_lea.hbm %s2177_s15, 128  ;;  %s1859_s12 = scalar_lea.hbm %s2329_s2, 256 }
  0x6f   : > { %p1855_p0 = scmp.ne.s32.totalorder %s2177_s15, %s1854_s8  ;;  %p1856_p2 = pneg %p2181_p7 }
  0x70   : > { %p1860_p10 = scmp.lt.s32.totalorder %s2177_s15, %s2329_s2  ;;  %p1861_p8 = scmp.lt.s32.totalorder %s1859_s12, %s1854_s8 }
  0x71   : > { %p1857_p5 = pnand %p1856_p2, %p1855_p0 }
  0x72   : > { %p1862_p12 = por %p1861_p8, %p1860_p10 }
  0x73   : > { %p1858_p9 = pneg %p1857_p5 }
  0x75   : > { %p1863_p4 = pnand %p1862_p12, %p1858_p9 }
  0x77   : > { %1866 = shalt.err (!%p1863_p4)
}
  0x78   : > { %s1867_s16 = scalar_lea.vmem %s424_s3, 128  ;;  %s1970_s28 = smov [#allocation2]  }
  0x79   : > { %p1868_p1 = scmp.ne.s32.totalorder %s424_s3, %s1867_s16  ;;  %s1872_s9 = sshll.u32 %s1970_s28, 4  ;;  %s1873_s9 = int_to_ptr.vmem [resolvable:$false] %s1872_s9 }
  0x7a   : > { %s1874_s10 = scalar_lea.vmem %s1873_s9, 256  ;;  %p1875_p0 = scmp.lt.s32.totalorder %s424_s3, %s1873_s9 }
  0x7b   : > { %p1870_p13 = pnand %p1868_p1, %p1856_p2  ;;  %p1876_p5 = scmp.lt.s32.totalorder %s1874_s10, %s1867_s16 }
  0x7d   : > { %p1871_p11 = pneg %p1870_p13  ;;  %p1877_p6 = por %p1876_p5, %p1875_p0 }
  0x7f   : > { %p1878_p3 = pnand %p1877_p6, %p1871_p11 }
  0x81   : > { %1881 = shalt.err (!%p1878_p3)
}
  0x82   : > { %1625 = dma.hbm_to_vmem [thread:$0]  (!%p2181_p7), %s2177_s15, 128, %s424_s3, %s413_s7  }
  0x83   : > { %p2365_p9 = scmp.ne.s32.totalorder %s2350_s24, 0 }
  0x84   : > { %s2202_s8 = sand.u32 (!%p2365_p9), 1, %s1950_s18   ;;  %p2366_p1 = scmp.ne.s32.totalorder (!%p2365_p9), %s2361_s27, 0 }
  0x85   : > { %432 = sbr.rel (%p2365_p9) target bundleno = 874 (0x36a), region = 64  ;;  %s1454_s29 = sshll.u32 (!%p2365_p9), %s2202_s8, 3 }
  0x86   : > { %s435_s9 = scalar_lea.sflag (!%p2365_p9), [#allocation3], %s2202_s8  ;;  %s2208_s10 = scalar_lea.vmem (!%p2365_p9), [#allocation2], %s1454_s29 }
  0x8a   : > { %1925 = dma.done.wait (%p2366_p1), %s435_s9, 128  }
  0x8b   : > { %1927 = vsyncadd (%p2366_p1), %s435_s9, 4294967168  ;;  %p2367_p3 = scmp.eq.s32.totalorder %s2055_s23, 0 }
  0x8d   : > { %1929 = dma.done.wait (%p2367_p3), [#allocation6], 16384   ;;  %p2368_p4 = pmov %p2367_p3 }
  0x8e   : > { %p2369_p6 = pmov %p2367_p3 }
  0x8f   : > { %1931 = vsyncadd (%p2368_p4), [#allocation6], 4294950912 }
  0x90   : > { %1933 = dma.done.wait (%p2369_p6), [#allocation9], 6192   ;;  %p2370_p11 = pmov %p2367_p3 }
  0x91   : > { %p2371_p13 = pmov %p2367_p3 }
  0x92   : > { %1935 = vsyncadd (%p2370_p11), [#allocation9], 4294961104 }
  0x93   : > { %1937 = dma.done.wait (%p2371_p13), [#allocation12], 32   ;;  %p2372_p7 = pmov %p2367_p3 }
  0x94   : > { %v1971_v0 = vmov 0.0   ;;  %v550_v1 = vld [vmem:[#allocation5 + $0xf8] sm:$0xff]  ;;  %v549_v2 = vld [vmem:[#allocation5 + $0xf0] sm:$0xff]  ;;  %v548_v3 = vld [vmem:[#allocation5 + $0xe8] sm:$0xff]  ;;  %vm1972_vm0 = vmmov 0   ;;  %v697_v34 = vlaneseq  ;;  %p509_p2 = scmp.lt.s32.totalorder %s2055_s23, 1 }
  0x95   : > { %1939 = vsyncadd (%p2372_p7), [#allocation12], 4294967264  ;;  %820 = vmatprep.mubr.f32.mxu0 %v1971_v0  ;;  %1535 = vmatprep.subr.mxu1 %v1971_v0  ;;  %v547_v4 = vld [vmem:[#allocation5 + $0xe0] sm:$0xff]  ;;  %v546_v5 = vld [vmem:[#allocation5 + $0xd8] sm:$0xff]  ;;  %vm827_vm1 = vcmask 64512   ;;  %s1471_s9 = sshll.u32 %s2055_s23, 7 }
  0x96   : > { %756 = vmatprep.subr.mxu0 %v550_v1  ;;  %v545_v6 = vld [vmem:[#allocation5 + $0xd0] sm:$0xff]  ;;  %v544_v7 = vld [vmem:[#allocation5 + $0xc8] sm:$0xff]  ;;  %v543_v8 = vld [vmem:[#allocation5 + $0xc0] sm:$0xff]  ;;  %1537 = vmatprep.mubr.msk.f32.mxu1 %vm1972_vm0, %v1971_v0  ;;  %v2238_v35 = vshrl.u32 %v697_v34, 7  ;;  %s510_s3 = scalar_select %p509_p2, %s2055_s23, 1 }
  0x97   : > { %757 = vmatpush1.msra.mxu0 %v549_v2  ;;  %v542_v9 = vld [vmem:[#allocation5 + $0xb8] sm:$0xff]  ;;  %v541_v10 = vld [vmem:[#allocation5 + $0xb0] sm:$0xff]  ;;  %v540_v11 = vld [vmem:[#allocation5 + $0xa8] sm:$0xff]  ;;  %s1278_s27 = scalar_lea.sflag [#allocation4], %s2202_s8  ;;  %p2373_p8 = scmp.ne.s32.totalorder %s2362_s21, 0 }
  0x98   : > { %758 = vmatprep.subr.mxu0 %v548_v3  ;;  %v539_v12 = vld [vmem:[#allocation5 + $0xa0] sm:$0xff]  ;;  %v538_v13 = vld [vmem:[#allocation5 + $0x98] sm:$0xff]  ;;  %v537_v14 = vld [vmem:[#allocation5 + $0x90] sm:$0xff]  ;;  %v2242_v36 = vsub.s32 0, %v2238_v35  ;;  %v2248_v38 = vsub.s32 1, %v2238_v35  ;;  %s1462_s24 = sshll.u32 %s510_s3, 3 }
  0x99   : > { %759 = vmatpush1.msra.mxu0 %v547_v4  ;;  %v536_v15 = vld [vmem:[#allocation5 + $0x88] sm:$0xff]  ;;  %v535_v16 = vld [vmem:[#allocation5 + $0x80] sm:$0xff]  ;;  %v534_v17 = vld [vmem:[#allocation5 + $0x78] sm:$0xff]  ;;  %s512_s14 = scalar_lea.vmem %s2327_s0, %s1462_s24  ;;  %s516_s30 = scalar_lea.vmem %s2328_s1, %s1462_s24 }
  0x9a   : > { %760 = vmatprep.subr.mxu0 %v546_v5  ;;  %v533_v18 = vld [vmem:[#allocation5 + $0x70] sm:$0xff]  ;;  %v532_v19 = vld [vmem:[#allocation5 + $0x68] sm:$0xff]  ;;  %v531_v20 = vld [vmem:[#allocation5 + $0x60] sm:$0xff]  ;;  %s1289_s24 = scalar_lea.hbm %s2338_s11, %s1471_s9 }
  0x9b   : > { %761 = vmatpush1.msra.mxu0 %v545_v6  ;;  %v530_v21 = vld [vmem:[#allocation5 + $0x58] sm:$0xff]  ;;  %v529_v22 = vld [vmem:[#allocation5 + $0x50] sm:$0xff]  ;;  %v528_v23 = vld [vmem:[#allocation5 + $0x48] sm:$0xff] }
  0x9c   : > { %762 = vmatprep.subr.mxu0 %v544_v7  ;;  %v527_v24 = vld [vmem:[#allocation5 + $0x40] sm:$0xff]  ;;  %v526_v25 = vld [vmem:[#allocation5 + $0x38] sm:$0xff]  ;;  %v525_v26 = vld [vmem:[#allocation5 + $0x30] sm:$0xff] }
  0x9d   : > { %763 = vmatpush1.msra.mxu0 %v543_v8  ;;  %v524_v27 = vld [vmem:[#allocation5 + $0x28] sm:$0xff]  ;;  %v523_v28 = vld [vmem:[#allocation5 + $0x20] sm:$0xff]  ;;  %v522_v29 = vld [vmem:[#allocation5 + $0x18] sm:$0xff] }
  0x9e   : > { %764 = vmatprep.subr.mxu0 %v542_v9  ;;  %v521_v30 = vld [vmem:[#allocation5 + $0x10] sm:$0xff]  ;;  %v520_v31 = vld [vmem:[#allocation5 + $0x8] sm:$0xff]  ;;  %v519_v32 = vld [vmem:[#allocation5] sm:$0xff] }
  0x9f   : > { %765 = vmatpush1.msra.mxu0 %v541_v10  ;;  %v2229_v33 = vld [vmem:[%s2208_s10] sm:$0xff]  ;;  %v596_v50 = vld [vmem:[#allocation7 + $0x168] sm:$0xff]  ;;  %v643_v51 = vld [vmem:[#allocation7 + $0x2e0] sm:$0xff]  ;;  %s508_s10 = scalar_lea.vmem [#allocation14], %s1454_s29 }
  0xa0   : > { %766 = vmatprep.subr.mxu0 %v540_v11  ;;  %v695_v37 = vld [vmem:[%s2331_s4] sm:$0x3]  ;;  %v646_v44 = vld [vmem:[#allocation7 + $0x2f8] sm:$0xff]  ;;  %v595_v53 = vld [vmem:[#allocation7 + $0x160] sm:$0xff]  ;;  %s1291_s3 = sshll.u32 %s508_s10, 4  ;;  %s1292_s3 = int_to_ptr.vmem [resolvable:$true] %s1291_s3 }
  0xa1   : > { %767 = vmatpush1.msra.mxu0 %v539_v12  ;;  %v700_v39 = vrot.slane %v695_v37, %v2242_v36  ;;  %v704_v40 = vrot.slane %v695_v37, %v2248_v38  ;;  %v517_v43 = vld [vmem:[%s512_s14] sm:$0xff]  ;;  %v598_v46 = vld [vmem:[#allocation7 + $0x178] sm:$0xff]  ;;  %v640_v55 = vld [vmem:[#allocation7 + $0x2c8] sm:$0xff]  ;;  %s1882_s15 = scalar_lea.vmem %s1292_s3, 128  ;;  %s1973_s14 = smov [#allocation14]  }
  0xa2   : > { %768 = vmatprep.subr.mxu0 %v538_v13  ;;  %v518_v48 = vld [vmem:[%s516_s30] sm:$0xff]  ;;  %v594_v52 = vld [vmem:[#allocation7 + $0x158] sm:$0xff]  ;;  %v591_v56 = vld [vmem:[#allocation7 + $0x140] sm:$0xff]  ;;  %p1883_p10 = scmp.ne.s32.totalorder %s1292_s3, %s1882_s15  ;;  %s1886_s12 = sshll.u32 %s1973_s14, 4  ;;  %s1887_s12 = int_to_ptr.vmem [resolvable:$false] %s1886_s12 }
  0xa3   : > { %769 = vmatpush1.msra.mxu0 %v537_v14  ;;  %v597_v49 = vld [vmem:[#allocation7 + $0x170] sm:$0xff]  ;;  %v592_v57 = vld [vmem:[#allocation7 + $0x148] sm:$0xff]  ;;  %v590_v58 = vld [vmem:[#allocation7 + $0x138] sm:$0xff]  ;;  %s1888_s23 = scalar_lea.vmem %s1887_s12, 256  ;;  %p1889_p5 = scmp.lt.s32.totalorder %s1292_s3, %s1887_s12 }
  0xa4   : > { %770 = vmatprep.subr.mxu0 %v536_v15  ;;  %v593_v54 = vld [vmem:[#allocation7 + $0x150] sm:$0xff]  ;;  %v588_v60 = vld [vmem:[#allocation7 + $0x128] sm:$0xff]  ;;  %v587_v62 = vld [vmem:[#allocation7 + $0x120] sm:$0xff]  ;;  %p1884_p12 = pnand %p1883_p10, %p2373_p8  ;;  %p1890_p9 = scmp.lt.s32.totalorder %s1888_s23, %s1882_s15 }
  0xa5   : > { %771 = vmatpush1.msra.mxu0 %v535_v16  ;;  %v637_v59 = vld [vmem:[#allocation7 + $0x2b0] sm:$0xff]  ;;  %v634_v63 = vld [vmem:[#allocation7 + $0x298] sm:$0xff]  ;;  %v584_v3 = vld [vmem:[#allocation7 + $0x108] sm:$0xff] }
  0xa6   : > { %772 = vmatprep.subr.mxu0 %v534_v17  ;;  %v589_v61 = vld [vmem:[#allocation7 + $0x130] sm:$0xff]  ;;  %v586_v2 = vld [vmem:[#allocation7 + $0x118] sm:$0xff]  ;;  %v631_v4 = vld [vmem:[#allocation7 + $0x280] sm:$0xff]  ;;  %p1885_p0 = pneg %p1884_p12  ;;  %p1891_p1 = por %p1890_p9, %p1889_p5 }
  0xa7   : > { %773 = vmatpush1.msra.mxu0 %v533_v18  ;;  %v585_v1 = vld [vmem:[#allocation7 + $0x110] sm:$0xff]  ;;  %v582_v5 = vld [vmem:[#allocation7 + $0xf8] sm:$0xff]  ;;  %v583_v6 = vld [vmem:[#allocation7 + $0x100] sm:$0xff] }
  0xa8   : > { %774 = vmatprep.subr.mxu0 %v532_v19  ;;  %v581_v7 = vld [vmem:[#allocation7 + $0xf0] sm:$0xff]  ;;  %v628_v8 = vld [vmem:[#allocation7 + $0x268] sm:$0xff]  ;;  %v579_v9 = vld [vmem:[#allocation7 + $0xe0] sm:$0xff]  ;;  %p1892_p3 = pnand %p1891_p1, %p1885_p0 }
  0xa9   : > { %775 = vmatpush1.msra.mxu0 %v531_v20  ;;  %v580_v10 = vld [vmem:[#allocation7 + $0xe8] sm:$0xff]  ;;  %v578_v11 = vld [vmem:[#allocation7 + $0xd8] sm:$0xff]  ;;  %v625_v12 = vld [vmem:[#allocation7 + $0x250] sm:$0xff] }
  0xaa   : > { %776 = vmatprep.subr.mxu0 %v530_v21  ;;  %v576_v13 = vld [vmem:[#allocation7 + $0xc8] sm:$0xff]  ;;  %v577_v14 = vld [vmem:[#allocation7 + $0xd0] sm:$0xff]  ;;  %v575_v15 = vld [vmem:[#allocation7 + $0xc0] sm:$0xff] }
  0xab   : > { %777 = vmatpush1.msra.mxu0 %v529_v22  ;;  %v622_v16 = vld [vmem:[#allocation7 + $0x238] sm:$0xff]  ;;  %v573_v17 = vld [vmem:[#allocation7 + $0xb0] sm:$0xff]  ;;  %v572_v19 = vld [vmem:[#allocation7 + $0xa8] sm:$0xff] }
  0xac   : > { %778 = vmatprep.subr.mxu0 %v528_v23  ;;  %v574_v18 = vld [vmem:[#allocation7 + $0xb8] sm:$0xff]  ;;  %v619_v20 = vld [vmem:[#allocation7 + $0x220] sm:$0xff]  ;;  %v569_v23 = vld [vmem:[#allocation7 + $0x90] sm:$0xff] }
  0xad   : > { %779 = vmatpush1.msra.mxu0 %v527_v24  ;;  %v570_v21 = vld [vmem:[#allocation7 + $0x98] sm:$0xff]  ;;  %v571_v22 = vld [vmem:[#allocation7 + $0xa0] sm:$0xff]  ;;  %v616_v24 = vld [vmem:[#allocation7 + $0x208] sm:$0xff] }
  0xae   : > { %780 = vmatprep.subr.mxu0 %v526_v25  ;;  %v567_v25 = vld [vmem:[#allocation7 + $0x80] sm:$0xff]  ;;  %v561_v34 = vld [vmem:[#allocation7 + $0x50] sm:$0xff]  ;;  %v562_v37 = vld [vmem:[#allocation7 + $0x58] sm:$0xff] }
  0xaf   : > { %781 = vmatpush1.msra.mxu0 %v525_v26  ;;  %v568_v26 = vld [vmem:[#allocation7 + $0x88] sm:$0xff] }
  0xb0   : > { %782 = vmatprep.subr.mxu0 %v524_v27  ;;  %v566_v27 = vld [vmem:[#allocation7 + $0x78] sm:$0xff] }
  0xb1   : > { %783 = vmatpush1.msra.mxu0 %v523_v28  ;;  %v613_v28 = vld [vmem:[#allocation7 + $0x1f0] sm:$0xff] }
  0xb2   : > { %784 = vmatprep.subr.mxu0 %v522_v29  ;;  %v564_v29 = vld [vmem:[#allocation7 + $0x68] sm:$0xff] }
  0xb3   : > { %785 = vmatpush1.msra.mxu0 %v521_v30  ;;  %v565_v30 = vld [vmem:[#allocation7 + $0x70] sm:$0xff] }
  0xb4   : > { %786 = vmatprep.subr.mxu0 %v520_v31  ;;  %v563_v31 = vld [vmem:[#allocation7 + $0x60] sm:$0xff] }
  0xb5   : > { %787 = vmatpush1.msra.mxu0 %v519_v32  ;;  %v610_v32 = vld [vmem:[#allocation7 + $0x1d8] sm:$0xff] }
  0xb6   : > { %821 = vmatmul.mubr.f32.vlgmr.msra.gmra.mxu0 %v2229_v33  ;;  %1530 = vmatprep.subr.mxu0 %v1971_v0 }
  0xb7   : > { %1532 = vmatprep.mubr.msk.f32.mxu0 %vm1972_vm0, %v1971_v0 }
 0x176   : > { %v822_v41 = vpop.f32.mrf.mxu0 }
 0x177   : > { %v823_v42 = vadd.f32 %v822_v41, %v700_v39  ;;  %v560_v39 = vld [vmem:[#allocation7 + $0x48] sm:$0xff]  ;;  %v558_v41 = vld [vmem:[#allocation7 + $0x38] sm:$0xff] }
 0x178   : > { %v824_v45 = vpop.f32.mrf.mxu0 }
 0x179   : > { %v825_v47 = vadd.f32 %v824_v45, %v704_v40  ;;  %1531 = vmatpush3.msra.mxu0 %v823_v42  ;;  %v607_v40 = vld [vmem:[#allocation7 + $0x1c0] sm:$0xff]  ;;  %v554_v45 = vld [vmem:[#allocation7 + $0x18] sm:$0xff] }
 0x17a   : > { %1533 = vmatmul.mubr.msk.f32.vlgmr.msra.gmra.mxu0 %vm827_vm1, %v517_v43  ;;  %1478 = vmatprep.subr.mxu0 %v646_v44  ;;  %v559_v42 = vld [vmem:[#allocation7 + $0x40] sm:$0xff]  ;;  %v557_v43 = vld [vmem:[#allocation7 + $0x30] sm:$0xff] }
 0x17b   : > { %1536 = vmatpush3.msra.mxu1 %v825_v47  ;;  %1479 = vmatpush3.msra.mxu0 %v598_v46  ;;  %v555_v44 = vld [vmem:[#allocation7 + $0x20] sm:$0xff]  ;;  %v552_v46 = vld [vmem:[#allocation7 + $0x8] sm:$0xff] }
 0x17c   : > { %1538 = vmatmul.mubr.msk.f32.vlgmr.msra.gmra.mxu1 %vm827_vm1, %v518_v48  ;;  %974 = vmatprep.subr.mxu1 %v597_v49  ;;  %v551_v47 = vld [vmem:[#allocation7] sm:$0xff]  ;;  %v645_v48 = vld [vmem:[#allocation7 + $0x2f0] sm:$0xff]  ;;  %v644_v49 = vld [vmem:[#allocation7 + $0x2e8] sm:$0xff] }
 0x17d   : > { %975 = vmatpush1.msra.mxu1 %v596_v50  ;;  %1480 = vmatprep.subr.mxu0 %v643_v51  ;;  %v642_v50 = vld [vmem:[#allocation7 + $0x2d8] sm:$0xff]  ;;  %v641_v51 = vld [vmem:[#allocation7 + $0x2d0] sm:$0xff] }
 0x17e   : > { %976 = vmatprep.subr.mxu1 %v594_v52  ;;  %1481 = vmatpush3.msra.mxu0 %v595_v53  ;;  %v639_v52 = vld [vmem:[#allocation7 + $0x2c0] sm:$0xff]  ;;  %v638_v53 = vld [vmem:[#allocation7 + $0x2b8] sm:$0xff] }
 0x17f   : > { %977 = vmatpush1.msra.mxu1 %v593_v54  ;;  %1482 = vmatprep.subr.mxu0 %v640_v55  ;;  %v636_v54 = vld [vmem:[#allocation7 + $0x2a8] sm:$0xff]  ;;  %v635_v55 = vld [vmem:[#allocation7 + $0x2a0] sm:$0xff] }
 0x180   : > { %978 = vmatprep.subr.mxu1 %v591_v56  ;;  %1483 = vmatpush3.msra.mxu0 %v592_v57  ;;  %v633_v56 = vld [vmem:[#allocation7 + $0x290] sm:$0xff]  ;;  %v632_v57 = vld [vmem:[#allocation7 + $0x288] sm:$0xff] }
 0x181   : > { %979 = vmatpush1.msra.mxu1 %v590_v58  ;;  %1484 = vmatprep.subr.mxu0 %v637_v59  ;;  %v630_v58 = vld [vmem:[#allocation7 + $0x278] sm:$0xff]  ;;  %v629_v59 = vld [vmem:[#allocation7 + $0x270] sm:$0xff] }
 0x182   : > { %980 = vmatprep.subr.mxu1 %v588_v60  ;;  %1485 = vmatpush3.msra.mxu0 %v589_v61  ;;  %v627_v60 = vld [vmem:[#allocation7 + $0x260] sm:$0xff]  ;;  %v626_v61 = vld [vmem:[#allocation7 + $0x258] sm:$0xff] }
 0x183   : > { %981 = vmatpush1.msra.mxu1 %v587_v62  ;;  %1486 = vmatprep.subr.mxu0 %v634_v63  ;;  %v624_v62 = vld [vmem:[#allocation7 + $0x248] sm:$0xff]  ;;  %v623_v63 = vld [vmem:[#allocation7 + $0x240] sm:$0xff] }
 0x184   : > { %982 = vmatprep.subr.mxu1 %v585_v1  ;;  %1487 = vmatpush3.msra.mxu0 %v586_v2  ;;  %v621_v1 = vld [vmem:[#allocation7 + $0x230] sm:$0xff]  ;;  %v620_v2 = vld [vmem:[#allocation7 + $0x228] sm:$0xff] }
 0x185   : > { %983 = vmatpush1.msra.mxu1 %v584_v3  ;;  %1488 = vmatprep.subr.mxu0 %v631_v4  ;;  %v618_v3 = vld [vmem:[#allocation7 + $0x218] sm:$0xff]  ;;  %v617_v4 = vld [vmem:[#allocation7 + $0x210] sm:$0xff] }
 0x186   : > { %984 = vmatprep.subr.mxu1 %v582_v5  ;;  %1489 = vmatpush3.msra.mxu0 %v583_v6  ;;  %v615_v5 = vld [vmem:[#allocation7 + $0x200] sm:$0xff]  ;;  %v614_v6 = vld [vmem:[#allocation7 + $0x1f8] sm:$0xff] }
 0x187   : > { %985 = vmatpush1.msra.mxu1 %v581_v7  ;;  %1490 = vmatprep.subr.mxu0 %v628_v8  ;;  %v612_v7 = vld [vmem:[#allocation7 + $0x1e8] sm:$0xff]  ;;  %v611_v8 = vld [vmem:[#allocation7 + $0x1e0] sm:$0xff] }
 0x188   : > { %986 = vmatprep.subr.mxu1 %v579_v9  ;;  %1491 = vmatpush3.msra.mxu0 %v580_v10  ;;  %v609_v9 = vld [vmem:[#allocation7 + $0x1d0] sm:$0xff]  ;;  %v608_v10 = vld [vmem:[#allocation7 + $0x1c8] sm:$0xff] }
 0x189   : > { %987 = vmatpush1.msra.mxu1 %v578_v11  ;;  %1492 = vmatprep.subr.mxu0 %v625_v12  ;;  %v606_v11 = vld [vmem:[#allocation7 + $0x1b8] sm:$0xff]  ;;  %v605_v12 = vld [vmem:[#allocation7 + $0x1b0] sm:$0xff] }
 0x18a   : > { %988 = vmatprep.subr.mxu1 %v576_v13  ;;  %1493 = vmatpush3.msra.mxu0 %v577_v14  ;;  %v604_v13 = vld [vmem:[#allocation7 + $0x1a8] sm:$0xff]  ;;  %v603_v14 = vld [vmem:[#allocation7 + $0x1a0] sm:$0xff] }
 0x18b   : > { %989 = vmatpush1.msra.mxu1 %v575_v15  ;;  %1494 = vmatprep.subr.mxu0 %v622_v16  ;;  %v556_v15 = vld [vmem:[#allocation7 + $0x28] sm:$0xff]  ;;  %v602_v16 = vld [vmem:[#allocation7 + $0x198] sm:$0xff] }
 0x18c   : > { %990 = vmatprep.subr.mxu1 %v573_v17  ;;  %1495 = vmatpush3.msra.mxu0 %v574_v18  ;;  %v601_v17 = vld [vmem:[#allocation7 + $0x190] sm:$0xff]  ;;  %v600_v18 = vld [vmem:[#allocation7 + $0x188] sm:$0xff] }
 0x18d   : > { %991 = vmatpush1.msra.mxu1 %v572_v19  ;;  %1496 = vmatprep.subr.mxu0 %v619_v20  ;;  %v553_v19 = vld [vmem:[#allocation7 + $0x10] sm:$0xff]  ;;  %v599_v20 = vld [vmem:[#allocation7 + $0x180] sm:$0xff] }
 0x18e   : > { %992 = vmatprep.subr.mxu1 %v570_v21  ;;  %1497 = vmatpush3.msra.mxu0 %v571_v22  ;;  %v693_v21 = vld [vmem:[#allocation8 + $0x170] sm:$0xff]  ;;  %v1464_v22 = vld [vmem:[#allocation11] ss:$0 sm:$0xff] }
 0x18f   : > { %993 = vmatpush1.msra.mxu1 %v569_v23  ;;  %1498 = vmatprep.subr.mxu0 %v616_v24  ;;  %v1465_v24 = vld [vmem:[#allocation13] ss:$0 sm:$0xff] }
 0x190   : > { %994 = vmatprep.subr.mxu1 %v567_v25  ;;  %1499 = vmatpush3.msra.mxu0 %v568_v26 }
 0x191   : > { %995 = vmatpush1.msra.mxu1 %v566_v27  ;;  %1500 = vmatprep.subr.mxu0 %v613_v28 }
 0x192   : > { %996 = vmatprep.subr.mxu1 %v564_v29  ;;  %1501 = vmatpush3.msra.mxu0 %v565_v30  ;;  %v692_v30 = vld [vmem:[#allocation8 + $0x168] sm:$0xff] }
 0x193   : > { %997 = vmatpush1.msra.mxu1 %v563_v31  ;;  %1502 = vmatprep.subr.mxu0 %v610_v32  ;;  %v690_v31 = vld [vmem:[#allocation8 + $0x158] sm:$0xff] }
 0x194   : > { %998 = vmatprep.subr.mxu1 %v561_v34  ;;  %1503 = vmatpush3.msra.mxu0 %v562_v37  ;;  %v694_v32 = vld [vmem:[#allocation8 + $0x178] sm:$0xff]  ;;  %v689_v34 = vld [vmem:[#allocation8 + $0x150] sm:$0xff]  ;;  %v687_v37 = vld [vmem:[#allocation8 + $0x140] sm:$0xff] }
 0x195   : > { %999 = vmatpush1.msra.mxu1 %v560_v39  ;;  %1504 = vmatprep.subr.mxu0 %v607_v40  ;;  %v691_v39 = vld [vmem:[#allocation8 + $0x160] sm:$0xff]  ;;  %v686_v40 = vld [vmem:[#allocation8 + $0x138] sm:$0xff] }
 0x196   : > { %1000 = vmatprep.subr.mxu1 %v558_v41  ;;  %1505 = vmatpush3.msra.mxu0 %v559_v42  ;;  %v684_v41 = vld [vmem:[#allocation8 + $0x128] sm:$0xff] }
 0x197   : > { %1001 = vmatpush1.msra.mxu1 %v557_v43  ;;  %1506 = vmatprep.subr.mxu0 %v604_v13  ;;  %v688_v42 = vld [vmem:[#allocation8 + $0x148] sm:$0xff]  ;;  %v683_v43 = vld [vmem:[#allocation8 + $0x120] sm:$0xff]  ;;  %v650_v13 = vld [vmem:[#allocation8 + $0x18] sm:$0xff] }
 0x198   : > { %1002 = vmatprep.subr.mxu1 %v555_v44  ;;  %1507 = vmatpush3.msra.mxu0 %v556_v15  ;;  %v681_v44 = vld [vmem:[#allocation8 + $0x110] sm:$0xff]  ;;  %v652_v15 = vld [vmem:[#allocation8 + $0x28] sm:$0xff] }
 0x199   : > { %1003 = vmatpush1.msra.mxu1 %v554_v45  ;;  %1508 = vmatprep.subr.mxu0 %v601_v17  ;;  %v685_v45 = vld [vmem:[#allocation8 + $0x130] sm:$0xff] }
 0x19a   : > { %1004 = vmatprep.subr.mxu1 %v552_v46  ;;  %1509 = vmatpush3.msra.mxu0 %v553_v19  ;;  %v680_v46 = vld [vmem:[#allocation8 + $0x108] sm:$0xff]  ;;  %v649_v17 = vld [vmem:[#allocation8 + $0x10] sm:$0xff] }
 0x19b   : > { %1005 = vmatpush1.msra.mxu1 %v551_v47  ;;  %1115 = vmatprep.subr.mxu0 %v693_v21  ;;  %v678_v47 = vld [vmem:[#allocation8 + $0xf8] sm:$0xff] }
 0x19c   : > { %1006 = vmatprep.subr.mxu1 %v645_v48  ;;  %v682_v48 = vld [vmem:[#allocation8 + $0x118] sm:$0xff] }
 0x19d   : > { %1007 = vmatpush2.msra.mxu1 %v644_v49  ;;  %v677_v49 = vld [vmem:[#allocation8 + $0xf0] sm:$0xff] }
 0x19e   : > { %1008 = vmatprep.subr.mxu1 %v642_v50  ;;  %v675_v50 = vld [vmem:[#allocation8 + $0xe0] sm:$0xff] }
 0x19f   : > { %1009 = vmatpush2.msra.mxu1 %v641_v51  ;;  %v679_v51 = vld [vmem:[#allocation8 + $0x100] sm:$0xff] }
 0x1a0   : > { %1010 = vmatprep.subr.mxu1 %v639_v52  ;;  %v674_v52 = vld [vmem:[#allocation8 + $0xd8] sm:$0xff] }
 0x1a1   : > { %1011 = vmatpush2.msra.mxu1 %v638_v53  ;;  %v672_v53 = vld [vmem:[#allocation8 + $0xc8] sm:$0xff] }
 0x1a2   : > { %1012 = vmatprep.subr.mxu1 %v636_v54  ;;  %v676_v54 = vld [vmem:[#allocation8 + $0xe8] sm:$0xff] }
 0x1a3   : > { %1013 = vmatpush2.msra.mxu1 %v635_v55  ;;  %v671_v55 = vld [vmem:[#allocation8 + $0xc0] sm:$0xff] }
 0x1a4   : > { %1014 = vmatprep.subr.mxu1 %v633_v56  ;;  %v669_v56 = vld [vmem:[#allocation8 + $0xb0] sm:$0xff] }
 0x1a5   : > { %1015 = vmatpush2.msra.mxu1 %v632_v57  ;;  %v673_v57 = vld [vmem:[#allocation8 + $0xd0] sm:$0xff] }
 0x1a6   : > { %1016 = vmatprep.subr.mxu1 %v630_v58  ;;  %v668_v58 = vld [vmem:[#allocation8 + $0xa8] sm:$0xff] }
 0x1a7   : > { %1017 = vmatpush2.msra.mxu1 %v629_v59  ;;  %v666_v59 = vld [vmem:[#allocation8 + $0x98] sm:$0xff] }
 0x1a8   : > { %1018 = vmatprep.subr.mxu1 %v627_v60  ;;  %v670_v60 = vld [vmem:[#allocation8 + $0xb8] sm:$0xff] }
 0x1a9   : > { %1019 = vmatpush2.msra.mxu1 %v626_v61  ;;  %v665_v61 = vld [vmem:[#allocation8 + $0x90] sm:$0xff] }
 0x1aa   : > { %1020 = vmatprep.subr.mxu1 %v624_v62  ;;  %v663_v62 = vld [vmem:[#allocation8 + $0x80] sm:$0xff] }
 0x1ab   : > { %1021 = vmatpush2.msra.mxu1 %v623_v63  ;;  %v667_v63 = vld [vmem:[#allocation8 + $0xa0] sm:$0xff] }
 0x1ac   : > { %1022 = vmatprep.subr.mxu1 %v621_v1  ;;  %v662_v1 = vld [vmem:[#allocation8 + $0x78] sm:$0xff] }
 0x1ad   : > { %1023 = vmatpush2.msra.mxu1 %v620_v2  ;;  %v660_v2 = vld [vmem:[#allocation8 + $0x68] sm:$0xff] }
 0x1ae   : > { %1024 = vmatprep.subr.mxu1 %v618_v3  ;;  %v664_v3 = vld [vmem:[#allocation8 + $0x88] sm:$0xff] }
 0x1af   : > { %1025 = vmatpush2.msra.mxu1 %v617_v4  ;;  %v659_v4 = vld [vmem:[#allocation8 + $0x60] sm:$0xff] }
 0x1b0   : > { %1026 = vmatprep.subr.mxu1 %v615_v5  ;;  %v657_v5 = vld [vmem:[#allocation8 + $0x50] sm:$0xff] }
 0x1b1   : > { %1027 = vmatpush2.msra.mxu1 %v614_v6  ;;  %v661_v6 = vld [vmem:[#allocation8 + $0x70] sm:$0xff] }
 0x1b2   : > { %1028 = vmatprep.subr.mxu1 %v612_v7  ;;  %v656_v7 = vld [vmem:[#allocation8 + $0x48] sm:$0xff] }
 0x1b3   : > { %1029 = vmatpush2.msra.mxu1 %v611_v8  ;;  %v654_v8 = vld [vmem:[#allocation8 + $0x38] sm:$0xff] }
 0x1b4   : > { %1030 = vmatprep.subr.mxu1 %v609_v9  ;;  %v658_v9 = vld [vmem:[#allocation8 + $0x58] sm:$0xff] }
 0x1b5   : > { %1031 = vmatpush2.msra.mxu1 %v608_v10  ;;  %v653_v10 = vld [vmem:[#allocation8 + $0x30] sm:$0xff] }
 0x1b6   : > { %1032 = vmatprep.subr.mxu1 %v606_v11  ;;  %v651_v11 = vld [vmem:[#allocation8 + $0x20] sm:$0xff] }
 0x1b7   : > { %1033 = vmatpush2.msra.mxu1 %v605_v12  ;;  %v655_v12 = vld [vmem:[#allocation8 + $0x40] sm:$0xff] }
 0x1b8   : > { %1034 = vmatprep.subr.mxu1 %v603_v14  ;;  %v648_v14 = vld [vmem:[#allocation8 + $0x8] sm:$0xff] }
 0x1b9   : > { %1035 = vmatpush2.msra.mxu1 %v602_v16  ;;  %v647_v16 = vld [vmem:[#allocation8] sm:$0xff] }
 0x1ba   : > { %1036 = vmatprep.subr.mxu1 %v600_v18  ;;  %v707_v18 = vld [vmem:[%s2333_s6] sm:$0x7] }
 0x1bb   : > { %1037 = vmatpush2.msra.mxu1 %v599_v20  ;;  %v724_v20 = vld [vmem:[#allocation10] sm:$0x7] }
 0x1bc   : > { %1540 = vmatprep.subr.mxu1 %v1971_v0 }
 0x23a   : > { %v897_v23 = vpop.f32.mrf.mxu0 }
 0x23b   : > { %v898_v25 = vadd.f32 %v1464_v22, %v897_v23  ;;  %v712_v22 = vrot.slane %v707_v18, %v2242_v36  ;;  %v729_v23 = vrot.slane %v724_v20, %v2242_v36 }
 0x23c   : > { %v970_v26 = vpop.f32.mrf.mxu1  ;;  %v1534_v27 = vpop.f32.mrf.mxu0 }
 0x23d   : > { %v971_v28 = vadd.f32 %v1465_v24, %v970_v26 }
 0x23e   : > { %v1539_v29 = vpop.f32.mrf.mxu1 }
 0x23f   : > { %1038 = vmatprep.mubr.f32.mxu1 %v971_v28  ;;  %1109 = vmatprep.mubr.f32.mxu0 %v971_v28 }
 0x240   : > { %1039 = vmatmul.mubr.f32.vlgmr.msra.gmra.mxu1 %v898_v25  ;;  %1110 = vmatmul.mubr.f32.vlgmr.msra.gmra.mxu0 %v898_v25 }
 0x241   : > { %1116 = vmatpush1.msra.mxu0 %v692_v30  ;;  %1179 = vmatprep.mubr.f32.mxu0 %v1971_v0 }
 0x242   : > { %1117 = vmatprep.subr.mxu0 %v690_v31  ;;  %1541 = vmatpush3.msra.mxu1 %v694_v32  ;;  %v733_v32 = vrot.slane %v724_v20, %v2248_v38 }
 0x243   : > { %1118 = vmatpush1.msra.mxu0 %v689_v34  ;;  %1542 = vmatprep.subr.mxu1 %v1971_v0 }
 0x244   : > { %1119 = vmatprep.subr.mxu0 %v687_v37  ;;  %1543 = vmatpush3.msra.mxu1 %v691_v39  ;;  %v716_v37 = vrot.slane %v707_v18, %v2248_v38 }
 0x245   : > { %1120 = vmatpush1.msra.mxu0 %v686_v40  ;;  %1544 = vmatprep.subr.mxu1 %v1971_v0 }
 0x246   : > { %1121 = vmatprep.subr.mxu0 %v684_v41  ;;  %1545 = vmatpush3.msra.mxu1 %v688_v42 }
 0x247   : > { %1122 = vmatpush1.msra.mxu0 %v683_v43  ;;  %1546 = vmatprep.subr.mxu1 %v1971_v0 }
 0x248   : > { %1123 = vmatprep.subr.mxu0 %v681_v44  ;;  %1547 = vmatpush3.msra.mxu1 %v685_v45  ;;  %v719_v44 = vsub.s32 2, %v2238_v35 }
 0x249   : > { %1124 = vmatpush1.msra.mxu0 %v680_v46  ;;  %1548 = vmatprep.subr.mxu1 %v1971_v0 }
 0x24a   : > { %1125 = vmatprep.subr.mxu0 %v678_v47  ;;  %1549 = vmatpush3.msra.mxu1 %v682_v48  ;;  %v737_v45 = vrot.slane %v724_v20, %v719_v44  ;;  %v720_v46 = vrot.slane %v707_v18, %v719_v44 }
 0x24b   : > { %1126 = vmatpush1.msra.mxu0 %v677_v49  ;;  %1550 = vmatprep.subr.mxu1 %v1971_v0 }
 0x24c   : > { %1127 = vmatprep.subr.mxu0 %v675_v50  ;;  %1551 = vmatpush3.msra.mxu1 %v679_v51 }
 0x24d   : > { %1128 = vmatpush1.msra.mxu0 %v674_v52  ;;  %1552 = vmatprep.subr.mxu1 %v1971_v0 }
 0x24e   : > { %1129 = vmatprep.subr.mxu0 %v672_v53  ;;  %1553 = vmatpush3.msra.mxu1 %v676_v54 }
 0x24f   : > { %1130 = vmatpush1.msra.mxu0 %v671_v55  ;;  %1554 = vmatprep.subr.mxu1 %v1971_v0 }
 0x250   : > { %1131 = vmatprep.subr.mxu0 %v669_v56  ;;  %1555 = vmatpush3.msra.mxu1 %v673_v57 }
 0x251   : > { %1132 = vmatpush1.msra.mxu0 %v668_v58  ;;  %1556 = vmatprep.subr.mxu1 %v1971_v0 }
 0x252   : > { %1133 = vmatprep.subr.mxu0 %v666_v59  ;;  %1557 = vmatpush3.msra.mxu1 %v670_v60 }
 0x253   : > { %1134 = vmatpush1.msra.mxu0 %v665_v61  ;;  %1558 = vmatprep.subr.mxu1 %v1971_v0 }
 0x254   : > { %1135 = vmatprep.subr.mxu0 %v663_v62  ;;  %1559 = vmatpush3.msra.mxu1 %v667_v63 }
 0x255   : > { %1136 = vmatpush1.msra.mxu0 %v662_v1  ;;  %1560 = vmatprep.subr.mxu1 %v1971_v0 }
 0x256   : > { %1137 = vmatprep.subr.mxu0 %v660_v2  ;;  %1561 = vmatpush3.msra.mxu1 %v664_v3 }
 0x257   : > { %1138 = vmatpush1.msra.mxu0 %v659_v4  ;;  %1562 = vmatprep.subr.mxu1 %v1971_v0 }
 0x258   : > { %1139 = vmatprep.subr.mxu0 %v657_v5  ;;  %1563 = vmatpush3.msra.mxu1 %v661_v6 }
 0x259   : > { %1140 = vmatpush1.msra.mxu0 %v656_v7  ;;  %1564 = vmatprep.subr.mxu1 %v1971_v0 }
 0x25a   : > { %1141 = vmatprep.subr.mxu0 %v654_v8  ;;  %1565 = vmatpush3.msra.mxu1 %v658_v9 }
 0x25b   : > { %1142 = vmatpush1.msra.mxu0 %v653_v10  ;;  %1566 = vmatprep.subr.mxu1 %v1971_v0 }
 0x25c   : > { %1143 = vmatprep.subr.mxu0 %v651_v11  ;;  %1567 = vmatpush3.msra.mxu1 %v655_v12 }
 0x25d   : > { %1144 = vmatpush1.msra.mxu0 %v650_v13  ;;  %1568 = vmatprep.subr.mxu1 %v1971_v0 }
 0x25e   : > { %1145 = vmatprep.subr.mxu0 %v648_v14  ;;  %1569 = vmatpush3.msra.mxu1 %v652_v15 }
 0x25f   : > { %1146 = vmatpush1.msra.mxu0 %v647_v16  ;;  %1570 = vmatprep.subr.mxu1 %v1971_v0 }
 0x260   : > { %1180 = vmatmul.mubr.f32.vlgmr.msra.gmra.mxu0 %v2229_v33  ;;  %1571 = vmatpush3.msra.mxu1 %v649_v17 }
 0x261   : > { %1572 = vmatprep.mubr.msk.f32.mxu1 %vm1972_vm0, %v1971_v0 }
 0x262   : > { %1573 = vmatmul.mubr.f32.vlgmr.msra.gmra.mxu1 %v2229_v33 }
 0x300   : > { %v1510_v19 = vpop.f32.mrf.mxu0  ;;  %v1040_v21 = vpop.f32.mrf.mxu1 }
 0x301   : > { %v1041_v27 = vadd.f32 %v1040_v21, %v712_v22 }
 0x302   : > { %v1511_v24 = vpop.f32.mrf.mxu0  ;;  %v1042_v25 = vpop.f32.mrf.mxu1 }
 0x303   : > { %v1043_v40 = vadd.f32 %v1042_v25, %v716_v37  ;;  %v1512_v47 = vadd.f32 %v1511_v24, %v1510_v19 }
 0x305   : > { %v1112_v51 = vadd.f32 %v1512_v47, %v720_v46 }
 0x320   : > { %v1181_v26 = vpop.f32.mrf.mxu0 }
 0x321   : > { %v1182_v28 = vadd.f32 %v1181_v26, %v729_v23 }
 0x322   : > { %v1252_v29 = vpop.f32.mrf.mxu1  ;;  %v1183_v34 = vpop.f32.mrf.mxu0 }
 0x323   : > { %v1256_v0 = vadd.f32 %v1182_v28, %v1041_v27  ;;  %v1184_v39 = vadd.f32 %v1183_v34, %v733_v32  ;;  %v1253_v48 = vadd.f32 %v1252_v29, %v737_v45 }
 0x324   : > { %v1574_v30 = vpop.f32.mrf.mxu1 }
 0x325   : > { %v1468_v31 = vmul.f32 -1.442695, %v1256_v0  ;;  %v1263_v41 = vadd.f32 %v1184_v39, %v1043_v40 }
 0x327   : > { %1688 = vpow2.f32 %v1468_v31  ;;  %v1469_v42 = vmul.f32 -1.442695, %v1263_v41 }
 0x329   : > { %1690 = vpow2.f32 %v1469_v42 }
 0x334   : > { %v1689_v36 = vpop.eup %1688 }
 0x335   : > { %v1260_v43 = vadd.f32 1.0, %v1689_v36 }
 0x336   : > { %v1691_v49 = vpop.eup %1690 }
 0x337   : > { %1692 = vrcp.f32 %v1260_v43  ;;  %v1267_v52 = vadd.f32 1.0, %v1691_v49 }
 0x344   : > { %v1693_v50 = vpop.eup %1692 }
 0x345   : > { %v1270_v38 = vmul.f32 %v1693_v50, %v1253_v48 }
 0x347   : > { %v1271_v53 = vadd.f32 %v1270_v38, %v1112_v51 }
 0x349   : > { %1694 = vtanh.f32 %v1271_v53 }
 0x34a   : > { %1696 = vrcp.f32 %v1267_v52 }
 0x356   : > { %v1695_v54 = vpop.eup %1694 }
 0x357   : > { %v1273_v55 = vsub.f32 %v2229_v33, %v1695_v54  ;;  %v1697_v35 = vpop.eup %1696 }
 0x359   : > { %v1274_v56 = vmul.f32 %v1697_v35, %v1273_v55 }
 0x35b   : > { %v1275_v57 = vadd.f32 %v1695_v54, %v1274_v56 }
 0x35d   : > { %1276 = vst [vmem:[%s508_s10] sm:$0xff] %v1275_v57 }
 0x35e   : > { %1895 = shalt.err (!%p1892_p3)
}
 0x35f   : > { %s1896_s29 = scalar_lea.hbm %s1289_s24, 128  ;;  %s1900_s30 = scalar_lea.hbm %s2338_s11, 256 }
 0x360   : > { %p1897_p4 = scmp.ne.s32.totalorder %s1289_s24, %s1896_s29  ;;  %p1901_p13 = scmp.lt.s32.totalorder %s1289_s24, %s2338_s11 }
 0x361   : > { %p1902_p7 = scmp.lt.s32.totalorder %s1900_s30, %s1896_s29 }
 0x362   : > { %p1898_p6 = pnand %p1897_p4, %p2373_p8 }
 0x363   : > { %p1903_p2 = por %p1902_p7, %p1901_p13 }
 0x364   : > { %p1899_p11 = pneg %p1898_p6 }
 0x366   : > { %p1904_p10 = pnand %p1903_p2, %p1899_p11 }
 0x368   : > { %1907 = shalt.err (!%p1904_p10)
}
 0x369   : > { %1601 = dma.vmem_to_hbm [thread:$0]  (%p2373_p8), %s1292_s3, 128, %s1289_s24, %s1278_s27  }
 0x36a PF: > { %s1303_s9 = sand.u32 1, %s1946_s17   ;;  %p2374_p12 = scmp.ne.s32.totalorder %s2363_s22, 0 }
 0x36b   : > { %p2375_p0 = scmp.ge.s32.totalorder %s1958_s20, 2  ;;  %s1304_s10 = scalar_lea.sflag [#allocation4], %s1303_s9 }
 0x36d   : > { %p1627_p5 = pnand %p2375_p0, %p2374_p12 }
 0x36f   : > { %p1628_p9 = pneg %p1627_p5 }
 0x371   : > { %1941 = dma.done.wait (%p1628_p9), %s1304_s10, 128  }
 0x372   : > { %1943 = vsyncadd (%p1628_p9), %s1304_s10, 4294967168  ;;  %p27_p1 = scmp.ge.s32.totalorder %s2139_s25, 4   ;;  %s2376_s17 = smov %s1950_s18 }
 0x373   : > { %s2377_s18 = smov %s1954_s19  ;;  %s2378_s19 = smov %s2150_s26 }
 0x374   : > { %s2379_s20 = smov %s2139_s25  ;;  %29 = sbr.rel (!%p27_p1) target bundleno = 15 (0xf), region = 139 }
 0x379   :  { %1309 = vsyncpa [#allocation3], 1 }
 0x37a   :  { %1311 = vsyncpa [#allocation3 + $0x1], 1 }
 0x37b   :  { %1312 = vsyncpa [#allocation6], 1 }
 0x37c   :  { %1313 = vsyncpa [#allocation9], 1 }
 0x37d   :  { %1314 = vsyncpa [#allocation12], 1 }
 0x37e   :  { %1315 = vsyncpa [#allocation4], 1 }
 0x37f   :  { %1317 = vsyncpa [#allocation4 + $0x1], 1 }

</bundles_post_ra>
